<compile_context>
chip_gen: v7x
topology: tpu7x:2x2x1
jax: 0.10.0
libtpu: 0.0.40
codegen_flags: <defaults>
</compile_context>

<pallas_src>
from functools import partial

import jax
import jax.numpy as jnp
from jax.experimental import pallas as pl
from jax.experimental.pallas import tpu as pltpu


def _round_up(x, m):
    return ((x + m - 1) // m) * m


# ------------------------------- kernel -------------------------------------
def decoder_kernel(xe_ref, h0_ref, wih_ref, whh_ref, bcomb_ref, bhn_ref,
                   wo_ref, bo_ref, out_ref, *, gate_stride):
    # xe_ref   : (T, Bp, Hp) f32   embedded inputs, time-major, lane/sublane padded
    # h0_ref   : (Bp, Hp)    f32   initial hidden state (zero padded)
    # wih_ref  : (Hp, Gp)    bf16  W_ih^T, gate blocks (r, z, n) at stride `gate_stride`
    # whh_ref  : (Hp, Gp)    bf16  W_hh^T, same gate layout
    # bcomb_ref: (1, Gp)     f32   [b_ir+b_hr, b_iz+b_hz, b_in]  (folded into gi)
    # bhn_ref  : (1, Hp)     f32   b_hn (must stay inside r*(h_n + b_hn))
    # wo_ref   : (Hp, Vp)    bf16  W_o^T
    # bo_ref   : (1, Vp)     f32   b_o
    # out_ref  : (T, Bp, Vp) f32   log-probabilities (log_softmax over the T axis)
    T, Bp, Hp = xe_ref.shape
    Vp = wo_ref.shape[1]
    Hs = gate_stride
    bf16 = jnp.bfloat16
    f32 = jnp.float32

    # --- hoisted input projection: ONE bf16 MXU matmul, f32 accumulation,
    #     input + hidden(r,z) biases folded.
    xe_flat = xe_ref[...].reshape(T * Bp, Hp).astype(bf16)
    gi_all = (jnp.dot(xe_flat, wih_ref[...], preferred_element_type=f32)
              + bcomb_ref[...]).reshape(T, Bp, -1)

    whh = whh_ref[...]                                    # bf16, resident in VMEM/regs
    wo = wo_ref[...]                                      # bf16
    # broadcasts hoisted out of the unrolled loop
    bhn_b = jnp.broadcast_to(bhn_ref[...][:, :Hs], (Bp, Hs))
    zpad = jnp.zeros((Bp, Hp - Hs), f32) if Hs < Hp else None

    # --- recurrence: only the serially-dependent h @ W_hh stays in the loop.
    #     T is small and static -> static unroll; the per-step output projection
    #     is interleaved so the MXU has work while sigmoid/tanh resolve.
    # TODO(synk): keep W_hh resident in MXU weight staging across the unrolled
    # steps (pltpu.matmul_push_rhs once, matmul_acc_lhs/matmul_pop per step) —
    # with the compact gate layout it is a single 128x128 bf16 tile.
    h = h0_ref[...]                                       # (Bp, Hp) f32
    logits_steps = []
    for t in range(T):
        gi = gi_all[t]                                                 # (Bp, Gp) f32, static slice
        gh = jnp.dot(h.astype(bf16), whh, preferred_element_type=f32)  # (Bp, Gp) f32, serial path
        i_r = gi[:, 0 * Hs:1 * Hs]
        i_z = gi[:, 1 * Hs:2 * Hs]
        i_n = gi[:, 2 * Hs:3 * Hs]
        h_r = gh[:, 0 * Hs:1 * Hs]
        h_z = gh[:, 1 * Hs:2 * Hs]
        h_n = gh[:, 2 * Hs:3 * Hs]
        r = jax.nn.sigmoid(i_r + h_r)                     # biases already folded (f32)
        z = jax.nn.sigmoid(i_z + h_z)
        n = jnp.tanh(i_n + r * (h_n + bhn_b))             # b_hn kept inside r*(.)
        h_new = (1.0 - z) * n + z * h[:, :Hs]             # (Bp, Hs)
        h = h_new if zpad is None else jnp.concatenate([h_new, zpad], axis=-1)
        # per-step output projection interleaved into the recurrence
        logits_steps.append(jnp.dot(h.astype(bf16), wo, preferred_element_type=f32))

    # --- logits kept in registers (no VMEM scratch round trip)
    logits = (jnp.concatenate(logits_steps, axis=0) + bo_ref[...]).reshape(T, Bp, Vp)

    # log_softmax over PyTorch dim=1 == the TIME axis == axis 0 in this layout.
    m = jnp.max(logits, axis=0, keepdims=True)
    s = logits - m
    lse = jnp.log(jnp.sum(jnp.exp(s), axis=0, keepdims=True))
    out_ref[...] = s - lse


# ------------------------------- wrapper ------------------------------------
def decoder_forward(x_tokens, h0, params):
    """x_tokens: (B, T) int32 ids, h0: (1, B, H). Returns (B, T, V) log-probs."""
    emb, w_ih, w_hh, b_ih, b_hh, w_o, b_o = params
    B, T = x_tokens.shape
    H = emb.shape[1]
    V = w_o.shape[0]
    f32, bf16 = jnp.float32, jnp.bfloat16

    Bp = _round_up(max(B, 8), 8)       # sublane padding
    Hp = _round_up(H, 128)             # lane padding
    Vp = _round_up(V, 128)             # lane padding

    # Gate layout: compact (stride H, one 128-lane tile for all 3 gates) when it
    # fits, else lane-aligned at Hp per gate.
    Hs = H if 3 * H <= 128 else Hp
    Gp = _round_up(3 * Hs, 128)

    # ---- glue: embedding gather, time-major transpose, padding, gate packing ----
    xe = jnp.transpose(emb[x_tokens].astype(f32), (1, 0, 2))          # (T, B, H)
    xe_p = jnp.zeros((T, Bp, Hp), f32).at[:, :B, :H].set(xe)
    h0_p = jnp.zeros((Bp, Hp), f32).at[:B, :H].set(h0[0].astype(f32))

    def pack_gate_weight(w):           # (3H, H) -> (Hp, Gp) bf16, gates at stride Hs
        w = w.astype(f32)
        out = jnp.zeros((Hp, Gp), f32)
        for g in range(3):
            out = out.at[:H, g * Hs:g * Hs + H].set(w[g * H:(g + 1) * H, :].T)
        return out.astype(bf16)

    def pack_gate_bias(vecs):          # 3 x (H,) -> (1, Gp) f32
        out = jnp.zeros((1, Gp), f32)
        for g, v in enumerate(vecs):
            out = out.at[0, g * Hs:g * Hs + H].set(v.astype(f32))
        return out

    b_ih32, b_hh32 = b_ih.astype(f32), b_hh.astype(f32)
    wih_p = pack_gate_weight(w_ih)
    whh_p = pack_gate_weight(w_hh)
    # Fold b_ih (all gates) + b_hh (r, z gates) into the hoisted input projection.
    # b_hn must remain inside r*(h_n + b_hn) to match PyTorch GRU semantics.
    bcomb = pack_gate_bias([b_ih32[:H] + b_hh32[:H],
                            b_ih32[H:2 * H] + b_hh32[H:2 * H],
                            b_ih32[2 * H:]])
    bhn_p = jnp.zeros((1, Hp), f32).at[0, :H].set(b_hh32[2 * H:])

    wo_p = jnp.zeros((Hp, Vp), f32).at[:H, :V].set(w_o.astype(f32).T).astype(bf16)
    bo_p = jnp.zeros((1, Vp), f32).at[0, :V].set(b_o.astype(f32))

    # TODO(synk): for production vocab sizes (V >> 128), tile the output projection
    # + T-axis log_softmax over a V grid axis marked "parallel" (BlockSpec'd
    # (Hp, TILE_V) W_o tiles, TILE_V 512-2048) and, for large B, add a "parallel"
    # batch axis so the independent recurrences shard across v7x's 2 TensorCores.
    out_p = pl.pallas_call(
        partial(decoder_kernel, gate_stride=Hs),
        out_shape=jax.ShapeDtypeStruct((T, Bp, Vp), f32),
        in_specs=[pl.BlockSpec(memory_space=pltpu.MemorySpace.VMEM)] * 8,
        out_specs=pl.BlockSpec(memory_space=pltpu.MemorySpace.VMEM),
    )(xe_p, h0_p, wih_p, whh_p, bcomb, bhn_p, wo_p, bo_p)

    return jnp.transpose(out_p[:, :B, :V], (1, 0, 2))                 # (B, T, V)


# --------------------------- pure-JAX reference ------------------------------
def decoder_reference(x_tokens, h0, params, matmul_dtype=jnp.float32):
    """matmul_dtype=jnp.bfloat16 mimics the kernel's bf16 MXU operands (f32 accum)."""
    emb, w_ih, w_hh, b_ih, b_hh, w_o, b_o = params
    H = emb.shape[1]
    f32 = jnp.float32

    def mm(a, b):
        return jnp.dot(a.astype(matmul_dtype), b.astype(matmul_dtype),
                       preferred_element_type=f32)

    xe = emb[x_tokens].astype(f32)                        # (B, T, H)
    h = h0[0].astype(f32)                                 # (B, H)
    T = xe.shape[1]
    outs = []
    for t in range(T):
        x_t = xe[:, t, :]
        gi = mm(x_t, w_ih.T.astype(f32)) + b_ih
        gh = mm(h, w_hh.T.astype(f32)) + b_hh
        i_r, i_z, i_n = gi[:, :H], gi[:, H:2 * H], gi[:, 2 * H:]
        h_r, h_z, h_n = gh[:, :H], gh[:, H:2 * H], gh[:, 2 * H:]
        r = jax.nn.sigmoid(i_r + h_r)
        z = jax.nn.sigmoid(i_z + h_z)
        n = jnp.tanh(i_n + r * h_n)
        h = (1.0 - z) * n + z * h
        outs.append(h)
    out = jnp.stack(outs, axis=1)                         # (B, T, H)
    logits = mm(out, w_o.T.astype(f32)) + b_o             # (B, T, V)
    return jax.nn.log_softmax(logits, axis=1)             # dim=1 as in the PyTorch code


# --------------------------------- main --------------------------------------
if __name__ == "__main__":
    B, T, H, V = 2, 8, 32, 30   # batch, seq len, hidden_size, output_size (vocab)

    key = jax.random.PRNGKey(0)
    ks = jax.random.split(key, 10)
    scale = 1.0 / jnp.sqrt(jnp.float32(H))

    emb  = jax.random.uniform(ks[0], (V, H), jnp.float32, -scale, scale)       # Embedding weight
    w_ih = jax.random.uniform(ks[1], (3 * H, H), jnp.float32, -scale, scale)   # GRU weight_ih_l0
    w_hh = jax.random.uniform(ks[2], (3 * H, H), jnp.float32, -scale, scale)   # GRU weight_hh_l0
    b_ih = jax.random.uniform(ks[3], (3 * H,), jnp.float32, -scale, scale)     # GRU bias_ih_l0
    b_hh = jax.random.uniform(ks[4], (3 * H,), jnp.float32, -scale, scale)     # GRU bias_hh_l0
    w_o  = jax.random.uniform(ks[5], (V, H), jnp.float32, -scale, scale)       # Linear weight
    b_o  = jax.random.uniform(ks[6], (V,), jnp.float32, -scale, scale)         # Linear bias
    params = (emb, w_ih, w_hh, b_ih, b_hh, w_o, b_o)

    x_tokens = jax.random.randint(ks[7], (B, T), 0, V, dtype=jnp.int32)        # token ids
    h0 = jax.random.normal(ks[8], (1, B, H), jnp.float32)                      # (num_layers, B, H)

    y = decoder_forward(x_tokens, h0, params)
    y = jax.block_until_ready(y)
    assert y.shape == (B, T, V)

    # Tight check against a reference that mimics the kernel's bf16 MXU operands.
    y_ref_bf16 = decoder_reference(x_tokens, h0, params, matmul_dtype=jnp.bfloat16)
    assert jnp.allclose(y, y_ref_bf16, rtol=5e-3, atol=5e-3), "mismatch vs bf16-matmul reference"

    # Loose sanity check against the full-f32 reference (bf16 MXU rounding only).
    y_ref_f32 = decoder_reference(x_tokens, h0, params, matmul_dtype=jnp.float32)
    assert jnp.allclose(y, y_ref_f32, rtol=1e-1, atol=1e-1), "mismatch vs f32 reference"

    print("KERNEL_OK")
</pallas_src>

<mosaic_0001>
module attributes {stable_mosaic.version = 11 : i64} {
  func.func @decoder_kernel(%arg0: memref<8x8x128xf32, #tpu.memory_space<vmem>>, %arg1: memref<8x128xf32, #tpu.memory_space<vmem>>, %arg2: memref<128x128xbf16, #tpu.memory_space<vmem>>, %arg3: memref<128x128xbf16, #tpu.memory_space<vmem>>, %arg4: memref<1x128xf32, #tpu.memory_space<vmem>>, %arg5: memref<1x128xf32, #tpu.memory_space<vmem>>, %arg6: memref<128x128xbf16, #tpu.memory_space<vmem>>, %arg7: memref<1x128xf32, #tpu.memory_space<vmem>>, %arg8: memref<8x8x128xf32, #tpu.memory_space<vmem>>) attributes {dimension_semantics = [], scalar_prefetch = 0 : i64, scratch_operands = 0 : i64, tpu.core_type = #tpu.core_type<tc>} {
    %c0 = arith.constant 0 : index
    %c0_0 = arith.constant 0 : index
    %c0_1 = arith.constant 0 : index
    %0 = vector.load %arg0[%c0, %c0_0, %c0_1] : memref<8x8x128xf32, #tpu.memory_space<vmem>>, vector<8x8x128xf32>
    %1 = vector.shape_cast %0 : vector<8x8x128xf32> to vector<64x128xf32>
    %2 = arith.truncf %1 : vector<64x128xf32> to vector<64x128xbf16>
    %c0_2 = arith.constant 0 : index
    %c0_3 = arith.constant 0 : index
    %3 = vector.load %arg2[%c0_2, %c0_3] : memref<128x128xbf16, #tpu.memory_space<vmem>>, vector<128x128xbf16>
    %cst = arith.constant dense<0.000000e+00> : vector<64x128xf32>
    %4 = tpu.matmul %2, %3, %cst {dimension_numbers = #tpu.dot_dimension_numbers<[1], [0], [0], [1], [0, 0, 1, 1], [], []>} : vector<64x128xbf16>, vector<128x128xbf16>, vector<64x128xf32> -> vector<64x128xf32>
    %c0_4 = arith.constant 0 : index
    %c0_5 = arith.constant 0 : index
    %5 = vector.load %arg4[%c0_4, %c0_5] : memref<1x128xf32, #tpu.memory_space<vmem>>, vector<1x128xf32>
    %6 = vector.broadcast %5 : vector<1x128xf32> to vector<64x128xf32>
    %7 = arith.addf %4, %6 : vector<64x128xf32>
    %8 = vector.shape_cast %7 : vector<64x128xf32> to vector<8x8x128xf32>
    %c0_6 = arith.constant 0 : index
    %c0_7 = arith.constant 0 : index
    %9 = vector.load %arg3[%c0_6, %c0_7] : memref<128x128xbf16, #tpu.memory_space<vmem>>, vector<128x128xbf16>
    %c0_8 = arith.constant 0 : index
    %c0_9 = arith.constant 0 : index
    %10 = vector.load %arg6[%c0_8, %c0_9] : memref<128x128xbf16, #tpu.memory_space<vmem>>, vector<128x128xbf16>
    %c0_10 = arith.constant 0 : index
    %c0_11 = arith.constant 0 : index
    %11 = vector.load %arg5[%c0_10, %c0_11] : memref<1x128xf32, #tpu.memory_space<vmem>>, vector<1x128xf32>
    %12 = vector.extract_strided_slice %11 {offsets = [0, 0], sizes = [1, 32], strides = [1, 1]} : vector<1x128xf32> to vector<1x32xf32>
    %13 = vector.shape_cast %12 : vector<1x32xf32> to vector<1x32xf32>
    %14 = vector.broadcast %13 : vector<1x32xf32> to vector<8x32xf32>
    %cst_12 = arith.constant 0.000000e+00 : f32
    %15 = vector.broadcast %cst_12 : f32 to vector<8x96xf32>
    %c0_13 = arith.constant 0 : index
    %c0_14 = arith.constant 0 : index
    %16 = vector.load %arg1[%c0_13, %c0_14] : memref<8x128xf32, #tpu.memory_space<vmem>>, vector<8x128xf32>
    %17 = vector.extract_strided_slice %8 {offsets = [0, 0, 0], sizes = [1, 8, 128], strides = [1, 1, 1]} : vector<8x8x128xf32> to vector<1x8x128xf32>
    %18 = vector.shape_cast %17 : vector<1x8x128xf32> to vector<8x128xf32>
    %19 = arith.truncf %16 : vector<8x128xf32> to vector<8x128xbf16>
    %cst_15 = arith.constant dense<0.000000e+00> : vector<8x128xf32>
    %20 = tpu.matmul %19, %9, %cst_15 {dimension_numbers = #tpu.dot_dimension_numbers<[1], [0], [0], [1], [0, 0, 1, 1], [], []>} : vector<8x128xbf16>, vector<128x128xbf16>, vector<8x128xf32> -> vector<8x128xf32>
    %21 = vector.extract_strided_slice %18 {offsets = [0, 0], sizes = [8, 32], strides = [1, 1]} : vector<8x128xf32> to vector<8x32xf32>
    %22 = vector.extract_strided_slice %18 {offsets = [0, 32], sizes = [8, 32], strides = [1, 1]} : vector<8x128xf32> to vector<8x32xf32>
    %23 = vector.extract_strided_slice %18 {offsets = [0, 64], sizes = [8, 32], strides = [1, 1]} : vector<8x128xf32> to vector<8x32xf32>
    %24 = vector.extract_strided_slice %20 {offsets = [0, 0], sizes = [8, 32], strides = [1, 1]} : vector<8x128xf32> to vector<8x32xf32>
    %25 = vector.extract_strided_slice %20 {offsets = [0, 32], sizes = [8, 32], strides = [1, 1]} : vector<8x128xf32> to vector<8x32xf32>
    %26 = vector.extract_strided_slice %20 {offsets = [0, 64], sizes = [8, 32], strides = [1, 1]} : vector<8x128xf32> to vector<8x32xf32>
    %27 = arith.addf %21, %24 : vector<8x32xf32>
    %28 = arith.negf %27 : vector<8x32xf32>
    %29 = math.exp %28 : vector<8x32xf32>
    %cst_16 = arith.constant 1.000000e+00 : f32
    %30 = vector.broadcast %cst_16 : f32 to vector<8x32xf32>
    %31 = arith.addf %30, %29 : vector<8x32xf32>
    %32 = arith.divf %30, %31 : vector<8x32xf32>
    %33 = arith.addf %22, %25 : vector<8x32xf32>
    %34 = arith.negf %33 : vector<8x32xf32>
    %35 = math.exp %34 : vector<8x32xf32>
    %cst_17 = arith.constant 1.000000e+00 : f32
    %36 = vector.broadcast %cst_17 : f32 to vector<8x32xf32>
    %37 = arith.addf %36, %35 : vector<8x32xf32>
    %38 = arith.divf %36, %37 : vector<8x32xf32>
    %39 = arith.addf %26, %14 : vector<8x32xf32>
    %40 = arith.mulf %32, %39 : vector<8x32xf32>
    %41 = arith.addf %23, %40 : vector<8x32xf32>
    %42 = math.tanh %41 : vector<8x32xf32>
    %cst_18 = arith.constant 1.000000e+00 : f32
    %43 = vector.broadcast %cst_18 : f32 to vector<8x32xf32>
    %44 = arith.subf %43, %38 : vector<8x32xf32>
    %45 = arith.mulf %44, %42 : vector<8x32xf32>
    %46 = vector.extract_strided_slice %16 {offsets = [0, 0], sizes = [8, 32], strides = [1, 1]} : vector<8x128xf32> to vector<8x32xf32>
    %47 = arith.mulf %38, %46 : vector<8x32xf32>
    %48 = arith.addf %45, %47 : vector<8x32xf32>
    %49 = tpu.concatenate %48, %15 in 1 : vector<8x32xf32>, vector<8x96xf32> -> vector<8x128xf32>
    %50 = arith.truncf %49 : vector<8x128xf32> to vector<8x128xbf16>
    %cst_19 = arith.constant dense<0.000000e+00> : vector<8x128xf32>
    %51 = tpu.matmul %50, %10, %cst_19 {dimension_numbers = #tpu.dot_dimension_numbers<[1], [0], [0], [1], [0, 0, 1, 1], [], []>} : vector<8x128xbf16>, vector<128x128xbf16>, vector<8x128xf32> -> vector<8x128xf32>
    %52 = vector.extract_strided_slice %8 {offsets = [1, 0, 0], sizes = [1, 8, 128], strides = [1, 1, 1]} : vector<8x8x128xf32> to vector<1x8x128xf32>
    %53 = vector.shape_cast %52 : vector<1x8x128xf32> to vector<8x128xf32>
    %54 = arith.truncf %49 : vector<8x128xf32> to vector<8x128xbf16>
    %cst_20 = arith.constant dense<0.000000e+00> : vector<8x128xf32>
    %55 = tpu.matmul %54, %9, %cst_20 {dimension_numbers = #tpu.dot_dimension_numbers<[1], [0], [0], [1], [0, 0, 1, 1], [], []>} : vector<8x128xbf16>, vector<128x128xbf16>, vector<8x128xf32> -> vector<8x128xf32>
    %56 = vector.extract_strided_slice %53 {offsets = [0, 0], sizes = [8, 32], strides = [1, 1]} : vector<8x128xf32> to vector<8x32xf32>
    %57 = vector.extract_strided_slice %53 {offsets = [0, 32], sizes = [8, 32], strides = [1, 1]} : vector<8x128xf32> to vector<8x32xf32>
    %58 = vector.extract_strided_slice %53 {offsets = [0, 64], sizes = [8, 32], strides = [1, 1]} : vector<8x128xf32> to vector<8x32xf32>
    %59 = vector.extract_strided_slice %55 {offsets = [0, 0], sizes = [8, 32], strides = [1, 1]} : vector<8x128xf32> to vector<8x32xf32>
    %60 = vector.extract_strided_slice %55 {offsets = [0, 32], sizes = [8, 32], strides = [1, 1]} : vector<8x128xf32> to vector<8x32xf32>
    %61 = vector.extract_strided_slice %55 {offsets = [0, 64], sizes = [8, 32], strides = [1, 1]} : vector<8x128xf32> to vector<8x32xf32>
    %62 = arith.addf %56, %59 : vector<8x32xf32>
    %63 = arith.negf %62 : vector<8x32xf32>
    %64 = math.exp %63 : vector<8x32xf32>
    %cst_21 = arith.constant 1.000000e+00 : f32
    %65 = vector.broadcast %cst_21 : f32 to vector<8x32xf32>
    %66 = arith.addf %65, %64 : vector<8x32xf32>
    %67 = arith.divf %65, %66 : vector<8x32xf32>
    %68 = arith.addf %57, %60 : vector<8x32xf32>
    %69 = arith.negf %68 : vector<8x32xf32>
    %70 = math.exp %69 : vector<8x32xf32>
    %cst_22 = arith.constant 1.000000e+00 : f32
    %71 = vector.broadcast %cst_22 : f32 to vector<8x32xf32>
    %72 = arith.addf %71, %70 : vector<8x32xf32>
    %73 = arith.divf %71, %72 : vector<8x32xf32>
    %74 = arith.addf %61, %14 : vector<8x32xf32>
    %75 = arith.mulf %67, %74 : vector<8x32xf32>
    %76 = arith.addf %58, %75 : vector<8x32xf32>
    %77 = math.tanh %76 : vector<8x32xf32>
    %cst_23 = arith.constant 1.000000e+00 : f32
    %78 = vector.broadcast %cst_23 : f32 to vector<8x32xf32>
    %79 = arith.subf %78, %73 : vector<8x32xf32>
    %80 = arith.mulf %79, %77 : vector<8x32xf32>
    %81 = vector.extract_strided_slice %49 {offsets = [0, 0], sizes = [8, 32], strides = [1, 1]} : vector<8x128xf32> to vector<8x32xf32>
    %82 = arith.mulf %73, %81 : vector<8x32xf32>
    %83 = arith.addf %80, %82 : vector<8x32xf32>
    %84 = tpu.concatenate %83, %15 in 1 : vector<8x32xf32>, vector<8x96xf32> -> vector<8x128xf32>
    %85 = arith.truncf %84 : vector<8x128xf32> to vector<8x128xbf16>
    %cst_24 = arith.constant dense<0.000000e+00> : vector<8x128xf32>
    %86 = tpu.matmul %85, %10, %cst_24 {dimension_numbers = #tpu.dot_dimension_numbers<[1], [0], [0], [1], [0, 0, 1, 1], [], []>} : vector<8x128xbf16>, vector<128x128xbf16>, vector<8x128xf32> -> vector<8x128xf32>
    %87 = vector.extract_strided_slice %8 {offsets = [2, 0, 0], sizes = [1, 8, 128], strides = [1, 1, 1]} : vector<8x8x128xf32> to vector<1x8x128xf32>
    %88 = vector.shape_cast %87 : vector<1x8x128xf32> to vector<8x128xf32>
    %89 = arith.truncf %84 : vector<8x128xf32> to vector<8x128xbf16>
    %cst_25 = arith.constant dense<0.000000e+00> : vector<8x128xf32>
    %90 = tpu.matmul %89, %9, %cst_25 {dimension_numbers = #tpu.dot_dimension_numbers<[1], [0], [0], [1], [0, 0, 1, 1], [], []>} : vector<8x128xbf16>, vector<128x128xbf16>, vector<8x128xf32> -> vector<8x128xf32>
    %91 = vector.extract_strided_slice %88 {offsets = [0, 0], sizes = [8, 32], strides = [1, 1]} : vector<8x128xf32> to vector<8x32xf32>
    %92 = vector.extract_strided_slice %88 {offsets = [0, 32], sizes = [8, 32], strides = [1, 1]} : vector<8x128xf32> to vector<8x32xf32>
    %93 = vector.extract_strided_slice %88 {offsets = [0, 64], sizes = [8, 32], strides = [1, 1]} : vector<8x128xf32> to vector<8x32xf32>
    %94 = vector.extract_strided_slice %90 {offsets = [0, 0], sizes = [8, 32], strides = [1, 1]} : vector<8x128xf32> to vector<8x32xf32>
    %95 = vector.extract_strided_slice %90 {offsets = [0, 32], sizes = [8, 32], strides = [1, 1]} : vector<8x128xf32> to vector<8x32xf32>
    %96 = vector.extract_strided_slice %90 {offsets = [0, 64], sizes = [8, 32], strides = [1, 1]} : vector<8x128xf32> to vector<8x32xf32>
    %97 = arith.addf %91, %94 : vector<8x32xf32>
    %98 = arith.negf %97 : vector<8x32xf32>
    %99 = math.exp %98 : vector<8x32xf32>
    %cst_26 = arith.constant 1.000000e+00 : f32
    %100 = vector.broadcast %cst_26 : f32 to vector<8x32xf32>
    %101 = arith.addf %100, %99 : vector<8x32xf32>
    %102 = arith.divf %100, %101 : vector<8x32xf32>
    %103 = arith.addf %92, %95 : vector<8x32xf32>
    %104 = arith.negf %103 : vector<8x32xf32>
    %105 = math.exp %104 : vector<8x32xf32>
    %cst_27 = arith.constant 1.000000e+00 : f32
    %106 = vector.broadcast %cst_27 : f32 to vector<8x32xf32>
    %107 = arith.addf %106, %105 : vector<8x32xf32>
    %108 = arith.divf %106, %107 : vector<8x32xf32>
    %109 = arith.addf %96, %14 : vector<8x32xf32>
    %110 = arith.mulf %102, %109 : vector<8x32xf32>
    %111 = arith.addf %93, %110 : vector<8x32xf32>
    %112 = math.tanh %111 : vector<8x32xf32>
    %cst_28 = arith.constant 1.000000e+00 : f32
    %113 = vector.broadcast %cst_28 : f32 to vector<8x32xf32>
    %114 = arith.subf %113, %108 : vector<8x32xf32>
    %115 = arith.mulf %114, %112 : vector<8x32xf32>
    %116 = vector.extract_strided_slice %84 {offsets = [0, 0], sizes = [8, 32], strides = [1, 1]} : vector<8x128xf32> to vector<8x32xf32>
    %117 = arith.mulf %108, %116 : vector<8x32xf32>
    %118 = arith.addf %115, %117 : vector<8x32xf32>
    %119 = tpu.concatenate %118, %15 in 1 : vector<8x32xf32>, vector<8x96xf32> -> vector<8x128xf32>
    %120 = arith.truncf %119 : vector<8x128xf32> to vector<8x128xbf16>
    %cst_29 = arith.constant dense<0.000000e+00> : vector<8x128xf32>
    %121 = tpu.matmul %120, %10, %cst_29 {dimension_numbers = #tpu.dot_dimension_numbers<[1], [0], [0], [1], [0, 0, 1, 1], [], []>} : vector<8x128xbf16>, vector<128x128xbf16>, vector<8x128xf32> -> vector<8x128xf32>
    %122 = vector.extract_strided_slice %8 {offsets = [3, 0, 0], sizes = [1, 8, 128], strides = [1, 1, 1]} : vector<8x8x128xf32> to vector<1x8x128xf32>
    %123 = vector.shape_cast %122 : vector<1x8x128xf32> to vector<8x128xf32>
    %124 = arith.truncf %119 : vector<8x128xf32> to vector<8x128xbf16>
    %cst_30 = arith.constant dense<0.000000e+00> : vector<8x128xf32>
    %125 = tpu.matmul %124, %9, %cst_30 {dimension_numbers = #tpu.dot_dimension_numbers<[1], [0], [0], [1], [0, 0, 1, 1], [], []>} : vector<8x128xbf16>, vector<128x128xbf16>, vector<8x128xf32> -> vector<8x128xf32>
    %126 = vector.extract_strided_slice %123 {offsets = [0, 0], sizes = [8, 32], strides = [1, 1]} : vector<8x128xf32> to vector<8x32xf32>
    %127 = vector.extract_strided_slice %123 {offsets = [0, 32], sizes = [8, 32], strides = [1, 1]} : vector<8x128xf32> to vector<8x32xf32>
    %128 = vector.extract_strided_slice %123 {offsets = [0, 64], sizes = [8, 32], strides = [1, 1]} : vector<8x128xf32> to vector<8x32xf32>
    %129 = vector.extract_strided_slice %125 {offsets = [0, 0], sizes = [8, 32], strides = [1, 1]} : vector<8x128xf32> to vector<8x32xf32>
    %130 = vector.extract_strided_slice %125 {offsets = [0, 32], sizes = [8, 32], strides = [1, 1]} : vector<8x128xf32> to vector<8x32xf32>
    %131 = vector.extract_strided_slice %125 {offsets = [0, 64], sizes = [8, 32], strides = [1, 1]} : vector<8x128xf32> to vector<8x32xf32>
    %132 = arith.addf %126, %129 : vector<8x32xf32>
    %133 = arith.negf %132 : vector<8x32xf32>
    %134 = math.exp %133 : vector<8x32xf32>
    %cst_31 = arith.constant 1.000000e+00 : f32
    %135 = vector.broadcast %cst_31 : f32 to vector<8x32xf32>
    %136 = arith.addf %135, %134 : vector<8x32xf32>
    %137 = arith.divf %135, %136 : vector<8x32xf32>
    %138 = arith.addf %127, %130 : vector<8x32xf32>
    %139 = arith.negf %138 : vector<8x32xf32>
    %140 = math.exp %139 : vector<8x32xf32>
    %cst_32 = arith.constant 1.000000e+00 : f32
    %141 = vector.broadcast %cst_32 : f32 to vector<8x32xf32>
    %142 = arith.addf %141, %140 : vector<8x32xf32>
    %143 = arith.divf %141, %142 : vector<8x32xf32>
    %144 = arith.addf %131, %14 : vector<8x32xf32>
    %145 = arith.mulf %137, %144 : vector<8x32xf32>
    %146 = arith.addf %128, %145 : vector<8x32xf32>
    %147 = math.tanh %146 : vector<8x32xf32>
    %cst_33 = arith.constant 1.000000e+00 : f32
    %148 = vector.broadcast %cst_33 : f32 to vector<8x32xf32>
    %149 = arith.subf %148, %143 : vector<8x32xf32>
    %150 = arith.mulf %149, %147 : vector<8x32xf32>
    %151 = vector.extract_strided_slice %119 {offsets = [0, 0], sizes = [8, 32], strides = [1, 1]} : vector<8x128xf32> to vector<8x32xf32>
    %152 = arith.mulf %143, %151 : vector<8x32xf32>
    %153 = arith.addf %150, %152 : vector<8x32xf32>
    %154 = tpu.concatenate %153, %15 in 1 : vector<8x32xf32>, vector<8x96xf32> -> vector<8x128xf32>
    %155 = arith.truncf %154 : vector<8x128xf32> to vector<8x128xbf16>
    %cst_34 = arith.constant dense<0.000000e+00> : vector<8x128xf32>
    %156 = tpu.matmul %155, %10, %cst_34 {dimension_numbers = #tpu.dot_dimension_numbers<[1], [0], [0], [1], [0, 0, 1, 1], [], []>} : vector<8x128xbf16>, vector<128x128xbf16>, vector<8x128xf32> -> vector<8x128xf32>
    %157 = vector.extract_strided_slice %8 {offsets = [4, 0, 0], sizes = [1, 8, 128], strides = [1, 1, 1]} : vector<8x8x128xf32> to vector<1x8x128xf32>
    %158 = vector.shape_cast %157 : vector<1x8x128xf32> to vector<8x128xf32>
    %159 = arith.truncf %154 : vector<8x128xf32> to vector<8x128xbf16>
    %cst_35 = arith.constant dense<0.000000e+00> : vector<8x128xf32>
    %160 = tpu.matmul %159, %9, %cst_35 {dimension_numbers = #tpu.dot_dimension_numbers<[1], [0], [0], [1], [0, 0, 1, 1], [], []>} : vector<8x128xbf16>, vector<128x128xbf16>, vector<8x128xf32> -> vector<8x128xf32>
    %161 = vector.extract_strided_slice %158 {offsets = [0, 0], sizes = [8, 32], strides = [1, 1]} : vector<8x128xf32> to vector<8x32xf32>
    %162 = vector.extract_strided_slice %158 {offsets = [0, 32], sizes = [8, 32], strides = [1, 1]} : vector<8x128xf32> to vector<8x32xf32>
    %163 = vector.extract_strided_slice %158 {offsets = [0, 64], sizes = [8, 32], strides = [1, 1]} : vector<8x128xf32> to vector<8x32xf32>
    %164 = vector.extract_strided_slice %160 {offsets = [0, 0], sizes = [8, 32], strides = [1, 1]} : vector<8x128xf32> to vector<8x32xf32>
    %165 = vector.extract_strided_slice %160 {offsets = [0, 32], sizes = [8, 32], strides = [1, 1]} : vector<8x128xf32> to vector<8x32xf32>
    %166 = vector.extract_strided_slice %160 {offsets = [0, 64], sizes = [8, 32], strides = [1, 1]} : vector<8x128xf32> to vector<8x32xf32>
    %167 = arith.addf %161, %164 : vector<8x32xf32>
    %168 = arith.negf %167 : vector<8x32xf32>
    %169 = math.exp %168 : vector<8x32xf32>
    %cst_36 = arith.constant 1.000000e+00 : f32
    %170 = vector.broadcast %cst_36 : f32 to vector<8x32xf32>
    %171 = arith.addf %170, %169 : vector<8x32xf32>
    %172 = arith.divf %170, %171 : vector<8x32xf32>
    %173 = arith.addf %162, %165 : vector<8x32xf32>
    %174 = arith.negf %173 : vector<8x32xf32>
    %175 = math.exp %174 : vector<8x32xf32>
    %cst_37 = arith.constant 1.000000e+00 : f32
    %176 = vector.broadcast %cst_37 : f32 to vector<8x32xf32>
    %177 = arith.addf %176, %175 : vector<8x32xf32>
    %178 = arith.divf %176, %177 : vector<8x32xf32>
    %179 = arith.addf %166, %14 : vector<8x32xf32>
    %180 = arith.mulf %172, %179 : vector<8x32xf32>
    %181 = arith.addf %163, %180 : vector<8x32xf32>
    %182 = math.tanh %181 : vector<8x32xf32>
    %cst_38 = arith.constant 1.000000e+00 : f32
    %183 = vector.broadcast %cst_38 : f32 to vector<8x32xf32>
    %184 = arith.subf %183, %178 : vector<8x32xf32>
    %185 = arith.mulf %184, %182 : vector<8x32xf32>
    %186 = vector.extract_strided_slice %154 {offsets = [0, 0], sizes = [8, 32], strides = [1, 1]} : vector<8x128xf32> to vector<8x32xf32>
    %187 = arith.mulf %178, %186 : vector<8x32xf32>
    %188 = arith.addf %185, %187 : vector<8x32xf32>
    %189 = tpu.concatenate %188, %15 in 1 : vector<8x32xf32>, vector<8x96xf32> -> vector<8x128xf32>
    %190 = arith.truncf %189 : vector<8x128xf32> to vector<8x128xbf16>
    %cst_39 = arith.constant dense<0.000000e+00> : vector<8x128xf32>
    %191 = tpu.matmul %190, %10, %cst_39 {dimension_numbers = #tpu.dot_dimension_numbers<[1], [0], [0], [1], [0, 0, 1, 1], [], []>} : vector<8x128xbf16>, vector<128x128xbf16>, vector<8x128xf32> -> vector<8x128xf32>
    %192 = vector.extract_strided_slice %8 {offsets = [5, 0, 0], sizes = [1, 8, 128], strides = [1, 1, 1]} : vector<8x8x128xf32> to vector<1x8x128xf32>
    %193 = vector.shape_cast %192 : vector<1x8x128xf32> to vector<8x128xf32>
    %194 = arith.truncf %189 : vector<8x128xf32> to vector<8x128xbf16>
    %cst_40 = arith.constant dense<0.000000e+00> : vector<8x128xf32>
    %195 = tpu.matmul %194, %9, %cst_40 {dimension_numbers = #tpu.dot_dimension_numbers<[1], [0], [0], [1], [0, 0, 1, 1], [], []>} : vector<8x128xbf16>, vector<128x128xbf16>, vector<8x128xf32> -> vector<8x128xf32>
    %196 = vector.extract_strided_slice %193 {offsets = [0, 0], sizes = [8, 32], strides = [1, 1]} : vector<8x128xf32> to vector<8x32xf32>
    %197 = vector.extract_strided_slice %193 {offsets = [0, 32], sizes = [8, 32], strides = [1, 1]} : vector<8x128xf32> to vector<8x32xf32>
    %198 = vector.extract_strided_slice %193 {offsets = [0, 64], sizes = [8, 32], strides = [1, 1]} : vector<8x128xf32> to vector<8x32xf32>
    %199 = vector.extract_strided_slice %195 {offsets = [0, 0], sizes = [8, 32], strides = [1, 1]} : vector<8x128xf32> to vector<8x32xf32>
    %200 = vector.extract_strided_slice %195 {offsets = [0, 32], sizes = [8, 32], strides = [1, 1]} : vector<8x128xf32> to vector<8x32xf32>
    %201 = vector.extract_strided_slice %195 {offsets = [0, 64], sizes = [8, 32], strides = [1, 1]} : vector<8x128xf32> to vector<8x32xf32>
    %202 = arith.addf %196, %199 : vector<8x32xf32>
    %203 = arith.negf %202 : vector<8x32xf32>
    %204 = math.exp %203 : vector<8x32xf32>
    %cst_41 = arith.constant 1.000000e+00 : f32
    %205 = vector.broadcast %cst_41 : f32 to vector<8x32xf32>
    %206 = arith.addf %205, %204 : vector<8x32xf32>
    %207 = arith.divf %205, %206 : vector<8x32xf32>
    %208 = arith.addf %197, %200 : vector<8x32xf32>
    %209 = arith.negf %208 : vector<8x32xf32>
    %210 = math.exp %209 : vector<8x32xf32>
    %cst_42 = arith.constant 1.000000e+00 : f32
    %211 = vector.broadcast %cst_42 : f32 to vector<8x32xf32>
    %212 = arith.addf %211, %210 : vector<8x32xf32>
    %213 = arith.divf %211, %212 : vector<8x32xf32>
    %214 = arith.addf %201, %14 : vector<8x32xf32>
    %215 = arith.mulf %207, %214 : vector<8x32xf32>
    %216 = arith.addf %198, %215 : vector<8x32xf32>
    %217 = math.tanh %216 : vector<8x32xf32>
    %cst_43 = arith.constant 1.000000e+00 : f32
    %218 = vector.broadcast %cst_43 : f32 to vector<8x32xf32>
    %219 = arith.subf %218, %213 : vector<8x32xf32>
    %220 = arith.mulf %219, %217 : vector<8x32xf32>
    %221 = vector.extract_strided_slice %189 {offsets = [0, 0], sizes = [8, 32], strides = [1, 1]} : vector<8x128xf32> to vector<8x32xf32>
    %222 = arith.mulf %213, %221 : vector<8x32xf32>
    %223 = arith.addf %220, %222 : vector<8x32xf32>
    %224 = tpu.concatenate %223, %15 in 1 : vector<8x32xf32>, vector<8x96xf32> -> vector<8x128xf32>
    %225 = arith.truncf %224 : vector<8x128xf32> to vector<8x128xbf16>
    %cst_44 = arith.constant dense<0.000000e+00> : vector<8x128xf32>
    %226 = tpu.matmul %225, %10, %cst_44 {dimension_numbers = #tpu.dot_dimension_numbers<[1], [0], [0], [1], [0, 0, 1, 1], [], []>} : vector<8x128xbf16>, vector<128x128xbf16>, vector<8x128xf32> -> vector<8x128xf32>
    %227 = vector.extract_strided_slice %8 {offsets = [6, 0, 0], sizes = [1, 8, 128], strides = [1, 1, 1]} : vector<8x8x128xf32> to vector<1x8x128xf32>
    %228 = vector.shape_cast %227 : vector<1x8x128xf32> to vector<8x128xf32>
    %229 = arith.truncf %224 : vector<8x128xf32> to vector<8x128xbf16>
    %cst_45 = arith.constant dense<0.000000e+00> : vector<8x128xf32>
    %230 = tpu.matmul %229, %9, %cst_45 {dimension_numbers = #tpu.dot_dimension_numbers<[1], [0], [0], [1], [0, 0, 1, 1], [], []>} : vector<8x128xbf16>, vector<128x128xbf16>, vector<8x128xf32> -> vector<8x128xf32>
    %231 = vector.extract_strided_slice %228 {offsets = [0, 0], sizes = [8, 32], strides = [1, 1]} : vector<8x128xf32> to vector<8x32xf32>
    %232 = vector.extract_strided_slice %228 {offsets = [0, 32], sizes = [8, 32], strides = [1, 1]} : vector<8x128xf32> to vector<8x32xf32>
    %233 = vector.extract_strided_slice %228 {offsets = [0, 64], sizes = [8, 32], strides = [1, 1]} : vector<8x128xf32> to vector<8x32xf32>
    %234 = vector.extract_strided_slice %230 {offsets = [0, 0], sizes = [8, 32], strides = [1, 1]} : vector<8x128xf32> to vector<8x32xf32>
    %235 = vector.extract_strided_slice %230 {offsets = [0, 32], sizes = [8, 32], strides = [1, 1]} : vector<8x128xf32> to vector<8x32xf32>
    %236 = vector.extract_strided_slice %230 {offsets = [0, 64], sizes = [8, 32], strides = [1, 1]} : vector<8x128xf32> to vector<8x32xf32>
    %237 = arith.addf %231, %234 : vector<8x32xf32>
    %238 = arith.negf %237 : vector<8x32xf32>
    %239 = math.exp %238 : vector<8x32xf32>
    %cst_46 = arith.constant 1.000000e+00 : f32
    %240 = vector.broadcast %cst_46 : f32 to vector<8x32xf32>
    %241 = arith.addf %240, %239 : vector<8x32xf32>
    %242 = arith.divf %240, %241 : vector<8x32xf32>
    %243 = arith.addf %232, %235 : vector<8x32xf32>
    %244 = arith.negf %243 : vector<8x32xf32>
    %245 = math.exp %244 : vector<8x32xf32>
    %cst_47 = arith.constant 1.000000e+00 : f32
    %246 = vector.broadcast %cst_47 : f32 to vector<8x32xf32>
    %247 = arith.addf %246, %245 : vector<8x32xf32>
    %248 = arith.divf %246, %247 : vector<8x32xf32>
    %249 = arith.addf %236, %14 : vector<8x32xf32>
    %250 = arith.mulf %242, %249 : vector<8x32xf32>
    %251 = arith.addf %233, %250 : vector<8x32xf32>
    %252 = math.tanh %251 : vector<8x32xf32>
    %cst_48 = arith.constant 1.000000e+00 : f32
    %253 = vector.broadcast %cst_48 : f32 to vector<8x32xf32>
    %254 = arith.subf %253, %248 : vector<8x32xf32>
    %255 = arith.mulf %254, %252 : vector<8x32xf32>
    %256 = vector.extract_strided_slice %224 {offsets = [0, 0], sizes = [8, 32], strides = [1, 1]} : vector<8x128xf32> to vector<8x32xf32>
    %257 = arith.mulf %248, %256 : vector<8x32xf32>
    %258 = arith.addf %255, %257 : vector<8x32xf32>
    %259 = tpu.concatenate %258, %15 in 1 : vector<8x32xf32>, vector<8x96xf32> -> vector<8x128xf32>
    %260 = arith.truncf %259 : vector<8x128xf32> to vector<8x128xbf16>
    %cst_49 = arith.constant dense<0.000000e+00> : vector<8x128xf32>
    %261 = tpu.matmul %260, %10, %cst_49 {dimension_numbers = #tpu.dot_dimension_numbers<[1], [0], [0], [1], [0, 0, 1, 1], [], []>} : vector<8x128xbf16>, vector<128x128xbf16>, vector<8x128xf32> -> vector<8x128xf32>
    %262 = vector.extract_strided_slice %8 {offsets = [7, 0, 0], sizes = [1, 8, 128], strides = [1, 1, 1]} : vector<8x8x128xf32> to vector<1x8x128xf32>
    %263 = vector.shape_cast %262 : vector<1x8x128xf32> to vector<8x128xf32>
    %264 = arith.truncf %259 : vector<8x128xf32> to vector<8x128xbf16>
    %cst_50 = arith.constant dense<0.000000e+00> : vector<8x128xf32>
    %265 = tpu.matmul %264, %9, %cst_50 {dimension_numbers = #tpu.dot_dimension_numbers<[1], [0], [0], [1], [0, 0, 1, 1], [], []>} : vector<8x128xbf16>, vector<128x128xbf16>, vector<8x128xf32> -> vector<8x128xf32>
    %266 = vector.extract_strided_slice %263 {offsets = [0, 0], sizes = [8, 32], strides = [1, 1]} : vector<8x128xf32> to vector<8x32xf32>
    %267 = vector.extract_strided_slice %263 {offsets = [0, 32], sizes = [8, 32], strides = [1, 1]} : vector<8x128xf32> to vector<8x32xf32>
    %268 = vector.extract_strided_slice %263 {offsets = [0, 64], sizes = [8, 32], strides = [1, 1]} : vector<8x128xf32> to vector<8x32xf32>
    %269 = vector.extract_strided_slice %265 {offsets = [0, 0], sizes = [8, 32], strides = [1, 1]} : vector<8x128xf32> to vector<8x32xf32>
    %270 = vector.extract_strided_slice %265 {offsets = [0, 32], sizes = [8, 32], strides = [1, 1]} : vector<8x128xf32> to vector<8x32xf32>
    %271 = vector.extract_strided_slice %265 {offsets = [0, 64], sizes = [8, 32], strides = [1, 1]} : vector<8x128xf32> to vector<8x32xf32>
    %272 = arith.addf %266, %269 : vector<8x32xf32>
    %273 = arith.negf %272 : vector<8x32xf32>
    %274 = math.exp %273 : vector<8x32xf32>
    %cst_51 = arith.constant 1.000000e+00 : f32
    %275 = vector.broadcast %cst_51 : f32 to vector<8x32xf32>
    %276 = arith.addf %275, %274 : vector<8x32xf32>
    %277 = arith.divf %275, %276 : vector<8x32xf32>
    %278 = arith.addf %267, %270 : vector<8x32xf32>
    %279 = arith.negf %278 : vector<8x32xf32>
    %280 = math.exp %279 : vector<8x32xf32>
    %cst_52 = arith.constant 1.000000e+00 : f32
    %281 = vector.broadcast %cst_52 : f32 to vector<8x32xf32>
    %282 = arith.addf %281, %280 : vector<8x32xf32>
    %283 = arith.divf %281, %282 : vector<8x32xf32>
    %284 = arith.addf %271, %14 : vector<8x32xf32>
    %285 = arith.mulf %277, %284 : vector<8x32xf32>
    %286 = arith.addf %268, %285 : vector<8x32xf32>
    %287 = math.tanh %286 : vector<8x32xf32>
    %cst_53 = arith.constant 1.000000e+00 : f32
    %288 = vector.broadcast %cst_53 : f32 to vector<8x32xf32>
    %289 = arith.subf %288, %283 : vector<8x32xf32>
    %290 = arith.mulf %289, %287 : vector<8x32xf32>
    %291 = vector.extract_strided_slice %259 {offsets = [0, 0], sizes = [8, 32], strides = [1, 1]} : vector<8x128xf32> to vector<8x32xf32>
    %292 = arith.mulf %283, %291 : vector<8x32xf32>
    %293 = arith.addf %290, %292 : vector<8x32xf32>
    %294 = tpu.concatenate %293, %15 in 1 : vector<8x32xf32>, vector<8x96xf32> -> vector<8x128xf32>
    %295 = arith.truncf %294 : vector<8x128xf32> to vector<8x128xbf16>
    %cst_54 = arith.constant dense<0.000000e+00> : vector<8x128xf32>
    %296 = tpu.matmul %295, %10, %cst_54 {dimension_numbers = #tpu.dot_dimension_numbers<[1], [0], [0], [1], [0, 0, 1, 1], [], []>} : vector<8x128xbf16>, vector<128x128xbf16>, vector<8x128xf32> -> vector<8x128xf32>
    %297 = tpu.concatenate %51, %86, %121, %156, %191, %226, %261, %296 in 0 : vector<8x128xf32>, vector<8x128xf32>, vector<8x128xf32>, vector<8x128xf32>, vector<8x128xf32>, vector<8x128xf32>, vector<8x128xf32>, vector<8x128xf32> -> vector<64x128xf32>
    %c0_55 = arith.constant 0 : index
    %c0_56 = arith.constant 0 : index
    %298 = vector.load %arg7[%c0_55, %c0_56] : memref<1x128xf32, #tpu.memory_space<vmem>>, vector<1x128xf32>
    %299 = vector.broadcast %298 : vector<1x128xf32> to vector<64x128xf32>
    %300 = arith.addf %297, %299 : vector<64x128xf32>
    %301 = vector.shape_cast %300 : vector<64x128xf32> to vector<8x8x128xf32>
    %cst_57 = arith.constant dense<0xFF800000> : vector<8x128xf32>
    %302 = vector.multi_reduction <maximumf>, %301, %cst_57 [0] : vector<8x8x128xf32> to vector<8x128xf32>
    %303 = vector.shape_cast %302 : vector<8x128xf32> to vector<1x8x128xf32>
    %304 = vector.broadcast %303 : vector<1x8x128xf32> to vector<8x8x128xf32>
    %305 = arith.subf %301, %304 : vector<8x8x128xf32>
    %306 = math.exp %305 : vector<8x8x128xf32>
    %cst_58 = arith.constant dense<0.000000e+00> : vector<8x128xf32>
    %307 = vector.multi_reduction <add>, %306, %cst_58 [0] : vector<8x8x128xf32> to vector<8x128xf32>
    %308 = vector.shape_cast %307 : vector<8x128xf32> to vector<1x8x128xf32>
    %309 = math.log %308 : vector<1x8x128xf32>
    %310 = vector.broadcast %309 : vector<1x8x128xf32> to vector<8x8x128xf32>
    %311 = arith.subf %305, %310 : vector<8x8x128xf32>
    %c0_59 = arith.constant 0 : index
    %c0_60 = arith.constant 0 : index
    %c0_61 = arith.constant 0 : index
    %312 = vector.load %arg8[%c0_59, %c0_60, %c0_61] : memref<8x8x128xf32, #tpu.memory_space<vmem>>, vector<8x8x128xf32>
    tpu.vector_store %arg8[%c0_59, %c0_60, %c0_61], %311 {strides = array<i32>} : memref<8x8x128xf32, #tpu.memory_space<vmem>>, vector<8x8x128xf32>,
    return
  }
}

</mosaic_0001>

<bundles_post_ra>
// kernel: tpu_custom_call.1
= control target key start
LH: loop header
LB: loop body
LE: loop exit
PB: predicated region body
PF: predicated region fallthrough
CT: control target
= control target key end

     0   :  { %13 = vsyncpa [#allocation3], 0  ;;  %s2892_s0 = inlined_call_operand.hbm [shape: f32[8,8,128], index: 0, kind: input, shape index: {}]   ;;  %s2893_s1 = inlined_call_operand.hbm [shape: f32[8,128], index: 1, kind: input, shape index: {}]   ;;  %s2894_s2 = inlined_call_operand.hbm [shape: bf16[128,128], index: 2, kind: input, shape index: {}]   ;;  %s2895_s3 = inlined_call_operand.hbm [shape: bf16[128,128], index: 3, kind: input, shape index: {}]   ;;  %s2896_s4 = inlined_call_operand.vmem [shape: f32[1,128], index: 4, kind: input, shape index: {}]   ;;  %s2897_s5 = inlined_call_operand.vmem [shape: f32[1,128], index: 5, kind: input, shape index: {}]   ;;  %s2898_s6 = inlined_call_operand.hbm [shape: bf16[128,128], index: 6, kind: input, shape index: {}]   ;;  %s2899_s7 = inlined_call_operand.vmem [shape: f32[1,128], index: 7, kind: input, shape index: {}]   ;;  %s2900_s8 = inlined_call_operand.hbm [shape: f32[8,8,128], index: 8, kind: output, shape index: {}]  }
   0x1   :  { %14 = vsyncpa [#allocation6], 0 }
   0x2   :  { %15 = vsyncpa [#allocation9], 0 }
   0x3   :  { %16 = vsyncpa [#allocation4], 0  ;;  %s2244_s27 = smov [#allocation5]   ;;  %s2104_s9 = scalar_lea.hbm %s2893_s1, 128 }
   0x4   :  { %s35_s28 = sshll.u32 %s2244_s27, 4  ;;  %p2105_p0 = scmp.ne.s32.totalorder %s2893_s1, %s2104_s9  ;;  %s36_s28 = int_to_ptr.vmem [resolvable:$true] %s35_s28 }
   0x5   :  { %p2108_p1 = scmp.lt.u32.totalorder %s2104_s9, %s2893_s1 }
   0x7   :  { %p2110_p2 = pnand %p2108_p1, %p2105_p0 }
   0x9   :  { %2113 = shalt.err (!%p2110_p2)
}
   0xa   :  { %s2114_s14 = scalar_lea.vmem %s36_s28, 128  ;;  %p2119_p4 = scmp.lt.s32.totalorder %s36_s28, %s36_s28 }
   0xb   :  { %p2115_p3 = scmp.ne.s32.totalorder %s36_s28, %s2114_s14  ;;  %p2120_p5 = scmp.lt.s32.totalorder %s2114_s14, %s2114_s14 }
   0xd   :  { %p2121_p6 = por %p2120_p5, %p2119_p4 }
   0xf   :  { %p2122_p7 = pnand %p2121_p6, %p2115_p3 }
  0x11   :  { %2125 = shalt.err (!%p2122_p7)
}
  0x12   :  { %38 = dma.hbm_to_vmem [thread:$0]  %s2893_s1, 128, %s36_s28, [#allocation6]  }
  0x13   :  { %s2245_s17 = smov [#allocation8]   ;;  %s2246_s19 = smov [#allocation2]  }
  0x14   :  { %s56_s18 = sshll.u32 %s2245_s17, 4  ;;  %s22_s20 = sshll.u32 %s2246_s19, 4  ;;  %s57_s18 = int_to_ptr.vmem [resolvable:$true] %s56_s18  ;;  %s23_s20 = int_to_ptr.vmem [resolvable:$true] %s22_s20 }
  0x15   :  { %s2126_s23 = scalar_lea.hbm %s2895_s3, 1024 }
  0x16   :  { %p2127_p8 = scmp.ne.s32.totalorder %s2895_s3, %s2126_s23  ;;  %p2130_p9 = scmp.lt.u32.totalorder %s2126_s23, %s2895_s3 }
  0x18   :  { %p2132_p10 = pnand %p2130_p9, %p2127_p8 }
  0x1a   :  { %2135 = shalt.err (!%p2132_p10)
}
  0x1b   :  { %s2136_s1 = scalar_lea.vmem %s57_s18, 1024  ;;  %p2141_p12 = scmp.lt.s32.totalorder %s57_s18, %s57_s18 }
  0x1c   :  { %p2137_p11 = scmp.ne.s32.totalorder %s57_s18, %s2136_s1  ;;  %p2142_p13 = scmp.lt.s32.totalorder %s2136_s1, %s2136_s1 }
  0x1e   :  { %p2143_p0 = por %p2142_p13, %p2141_p12 }
  0x20   :  { %p2144_p1 = pnand %p2143_p0, %p2137_p11 }
  0x22   :  { %2147 = shalt.err (!%p2144_p1)
}
  0x23   :  { %s2247_s28 = smov 64   ;;  %s2248_s29 = smov 4  }
  0x24   :  { %62 = dma.hbm_to_vmem [thread:$0]  %s2895_s3, 1024, %s57_s18, [#allocation9], %s2247_s28, %s2247_s28, %s2248_s29  }
  0x25   :  { %s2148_s12 = scalar_lea.hbm %s2892_s0, 1024 }
  0x26   :  { %p2149_p2 = scmp.ne.s32.totalorder %s2892_s0, %s2148_s12  ;;  %p2152_p3 = scmp.lt.u32.totalorder %s2148_s12, %s2892_s0 }
  0x28   :  { %p2154_p4 = pnand %p2152_p3, %p2149_p2 }
  0x2a   :  { %2157 = shalt.err (!%p2154_p4)
}
  0x2b   :  { %s2158_s17 = scalar_lea.vmem %s23_s20, 1024  ;;  %p2163_p6 = scmp.lt.s32.totalorder %s23_s20, %s23_s20 }
  0x2c   :  { %p2159_p5 = scmp.ne.s32.totalorder %s23_s20, %s2158_s17  ;;  %p2164_p7 = scmp.lt.s32.totalorder %s2158_s17, %s2158_s17 }
  0x2e   :  { %p2165_p8 = por %p2164_p7, %p2163_p6 }
  0x30   :  { %p2166_p9 = pnand %p2165_p8, %p2159_p5 }
  0x32   :  { %2169 = shalt.err (!%p2166_p9)
}
  0x33   :  { %s2249_s3 = smov 128   ;;  %s2250_s18 = smov 8  }
  0x34   :  { %28 = dma.hbm_to_vmem [thread:$0]  %s2892_s0, 1024, %s23_s20, [#allocation3], %s2249_s3, %s2249_s3, %s2250_s18  }
  0x35   :  { %s2251_s22 = smov [#allocation7]   ;;  %s2252_s24 = smov [#allocation10]  }
  0x36   :  { %s44_s23 = sshll.u32 %s2251_s22, 4  ;;  %s72_s25 = sshll.u32 %s2252_s24, 4  ;;  %s45_s23 = int_to_ptr.vmem [resolvable:$true] %s44_s23  ;;  %s73_s25 = int_to_ptr.vmem [resolvable:$true] %s72_s25 }
  0x37   :  { %s2170_s1 = scalar_lea.hbm %s2894_s2, 1024 }
  0x38   :  { %p2171_p10 = scmp.ne.s32.totalorder %s2894_s2, %s2170_s1  ;;  %p2174_p11 = scmp.lt.u32.totalorder %s2170_s1, %s2894_s2 }
  0x3a   :  { %p2176_p12 = pnand %p2174_p11, %p2171_p10 }
  0x3c   :  { %2179 = shalt.err (!%p2176_p12)
}
  0x3d   :  { %s2180_s0 = scalar_lea.vmem %s45_s23, 1024  ;;  %p2185_p0 = scmp.lt.s32.totalorder %s45_s23, %s45_s23 }
  0x3e   :  { %p2181_p13 = scmp.ne.s32.totalorder %s45_s23, %s2180_s0  ;;  %p2186_p1 = scmp.lt.s32.totalorder %s2180_s0, %s2180_s0 }
  0x40   :  { %p2187_p2 = por %p2186_p1, %p2185_p0 }
  0x42   :  { %p2188_p3 = pnand %p2187_p2, %p2181_p13 }
  0x44   :  { %2191 = shalt.err (!%p2188_p3)
}
  0x45   :  { %50 = dma.hbm_to_vmem [thread:$0]  %s2894_s2, 1024, %s45_s23, [#allocation6], %s2247_s28, %s2247_s28, %s2248_s29  }
  0x46   :  { %s2192_s15 = scalar_lea.hbm %s2898_s6, 1024 }
  0x47   :  { %p2193_p4 = scmp.ne.s32.totalorder %s2898_s6, %s2192_s15  ;;  %p2196_p5 = scmp.lt.u32.totalorder %s2192_s15, %s2898_s6 }
  0x49   :  { %p2198_p6 = pnand %p2196_p5, %p2193_p4 }
  0x4b   :  { %2201 = shalt.err (!%p2198_p6)
}
  0x4c   :  { %s2202_s22 = scalar_lea.vmem %s73_s25, 1024  ;;  %p2207_p8 = scmp.lt.s32.totalorder %s73_s25, %s73_s25 }
  0x4d   :  { %p2203_p7 = scmp.ne.s32.totalorder %s73_s25, %s2202_s22  ;;  %p2208_p9 = scmp.lt.s32.totalorder %s2202_s22, %s2202_s22 }
  0x4f   :  { %p2209_p10 = por %p2208_p9, %p2207_p8 }
  0x51   :  { %p2210_p11 = pnand %p2209_p10, %p2203_p7 }
  0x53   :  { %2213 = shalt.err (!%p2210_p11)
}
  0x54   :  { %78 = dma.hbm_to_vmem [thread:$0]  %s2898_s6, 1024, %s73_s25, [#allocation9], %s2247_s28, %s2247_s28, %s2248_s29  }
  0x55   :  { %2236 = dma.done.wait [#allocation3], 1024  }
  0x56   :  { %2237 = vsyncadd [#allocation3], 4294966272 }
  0x57   :  { %2238 = dma.done.wait [#allocation6], 1152  }
  0x58   :  { %2239 = vsyncadd [#allocation6], 4294966144 }
  0x59   :  { %2240 = dma.done.wait [#allocation9], 2048  }
  0x5a   :  { %2241 = vsyncadd [#allocation9], 4294965248  ;;  %v2253_v0 = vmov 0.0   ;;  %vm2254_vm0 = vmmov 0   ;;  %v2005_v1 = vld [vmem:[#allocation7] sm:$0xff]   ;;  %v2007_v3 = vld [vmem:[#allocation7 + $0x8] sm:$0xff]  }
  0x5b   :  { %1671 = vmatprep.subr.bf16.mxu1 %v2253_v0  ;;  %1687 = vmatprep.mubr.msk.bf16.mxu1 %vm2254_vm0, %v2253_v0  ;;  %v2378_v2 = vld [vmem:[#allocation8] sm:$0xff]   ;;  %v2381_v4 = vld [vmem:[#allocation8 + $0x8] sm:$0xff]   ;;  %v2009_v5 = vld [vmem:[#allocation7 + $0x10] sm:$0xff]   ;;  %s2256_s26 = smov 96   ;;  %vm411_vm1 = vcmask 261120  }
  0x5c   :  { %1647 = vmatprep.subr.bf16.mxu0 %v2005_v1  ;;  %1672 = vmatpush3.bf16.msra.mxu1 %v2378_v2  ;;  %v2385_v6 = vld [vmem:[#allocation8 + $0x10] sm:$0xff]   ;;  %v2011_v7 = vld [vmem:[#allocation7 + $0x18] sm:$0xff]   ;;  %v2013_v9 = vld [vmem:[#allocation7 + $0x20] sm:$0xff]  }
  0x5d   :  { %1648 = vmatpush3.bf16.msra.mxu0 %v2005_v1  ;;  %1673 = vmatprep.subr.bf16.mxu1 %v2253_v0  ;;  %v2389_v8 = vld [vmem:[#allocation8 + $0x18] sm:$0xff]   ;;  %v2393_v10 = vld [vmem:[#allocation8 + $0x20] sm:$0xff]   ;;  %v2015_v11 = vld [vmem:[#allocation7 + $0x28] sm:$0xff]  }
  0x5e   :  { %1649 = vmatprep.subr.bf16.mxu0 %v2007_v3  ;;  %v97_v12 = vld [vmem:[#allocation2] sm:$0xff]  ;;  %v98_v13 = vld [vmem:[#allocation2 + $0x8] sm:$0xff]  ;;  %v2396_v14 = vld [vmem:[#allocation8 + $0x28] sm:$0xff]  }
  0x5f   :  { %v105_v15 = vpack.c.bf16 %v98_v13, %v97_v12  ;;  %v1420_v16 = vld [vmem:[%s2897_s5] ss:$0 sm:$0xff]  ;;  %v2017_v17 = vld [vmem:[#allocation7 + $0x30] sm:$0xff]   ;;  %v99_v22 = vld [vmem:[#allocation2 + $0x10] sm:$0xff]  ;;  %s2255_s5 = smov 32  }
  0x60   :  { %1674 = vmatpush3.bf16.msra.mxu1 %v2381_v4  ;;  %380 = vrot.lane.b32.xlu0 %v1420_v16, %s2247_s28  ;;  %v2405_v18 = vld [vmem:[#allocation8 + $0x30] sm:$0xff]   ;;  %v2019_v19 = vld [vmem:[#allocation7 + $0x38] sm:$0xff]   ;;  %v2451_v47 = vld [vmem:[#allocation10] sm:$0xff]  }
  0x61   :  { %1650 = vmatpush3.bf16.msra.mxu0 %v2007_v3  ;;  %1675 = vmatprep.subr.bf16.mxu1 %v2253_v0  ;;  %v2408_v20 = vld [vmem:[#allocation8 + $0x38] sm:$0xff]   ;;  %v100_v23 = vld [vmem:[#allocation2 + $0x18] sm:$0xff]  ;;  %v2453_v48 = vld [vmem:[#allocation10 + $0x8] sm:$0xff]  }
  0x62   :  { %1651 = vmatprep.subr.bf16.mxu0 %v2009_v5  ;;  %1663 = vmatprep.mubr.bf16.mxu0 %v105_v15  ;;  %v283_v21 = vld [vmem:[#allocation5] sm:$0xff]  ;;  %v106_v25 = vpack.c.bf16 %v100_v23, %v99_v22  ;;  %v102_v50 = vld [vmem:[#allocation2 + $0x28] sm:$0xff]  ;;  %v103_v51 = vld [vmem:[#allocation2 + $0x30] sm:$0xff] }
  0x63   :  { %v284_v24 = vpack.c.bf16 %v283_v21, %v283_v21  ;;  %v2447_v36 = vld [vmem:[%s2896_s4] ss:$0 sm:$0xff]  ;;  %v104_v53 = vld [vmem:[#allocation2 + $0x38] sm:$0xff]  ;;  %v2469_v58 = vld [vmem:[#allocation10 + $0x20] sm:$0xff]  }
  0x64   :  { %1676 = vmatpush3.bf16.msra.mxu1 %v2385_v6  ;;  %v101_v49 = vld [vmem:[#allocation2 + $0x20] sm:$0xff]  ;;  %v108_v54 = vpack.c.bf16 %v104_v53, %v103_v51  ;;  %v2458_v55 = vld [vmem:[#allocation10 + $0x10] sm:$0xff]   ;;  %v2473_v59 = vld [vmem:[#allocation10 + $0x28] sm:$0xff]  }
  0x65   :  { %1652 = vmatpush3.bf16.msra.mxu0 %v2009_v5  ;;  %1677 = vmatprep.subr.bf16.mxu1 %v2253_v0  ;;  %v107_v52 = vpack.c.bf16 %v102_v50, %v101_v49  ;;  %v2465_v57 = vld [vmem:[#allocation10 + $0x18] sm:$0xff]   ;;  %v2477_v60 = vld [vmem:[#allocation10 + $0x30] sm:$0xff]   ;;  %vm2497_vm2 = vmpackc.low %vm411_vm1, %vm411_vm1 }
  0x66   :  { %1653 = vmatprep.subr.bf16.mxu0 %v2011_v7  ;;  %v2481_v61 = vld [vmem:[#allocation10 + $0x38] sm:$0xff]  }
  0x68   :  { %1678 = vmatpush3.bf16.msra.mxu1 %v2389_v8 }
  0x69   :  { %1654 = vmatpush3.bf16.msra.mxu0 %v2011_v7  ;;  %1679 = vmatprep.subr.bf16.mxu1 %v2253_v0 }
  0x6a   :  { %1655 = vmatprep.subr.bf16.mxu0 %v2013_v9 }
  0x6c   :  { %1680 = vmatpush3.bf16.msra.mxu1 %v2393_v10 }
  0x6d   :  { %1656 = vmatpush3.bf16.msra.mxu0 %v2013_v9  ;;  %1681 = vmatprep.subr.bf16.mxu1 %v2253_v0 }
  0x6e   :  { %1657 = vmatprep.subr.bf16.mxu0 %v2015_v11 }
  0x70   :  { %1682 = vmatpush3.bf16.msra.mxu1 %v2396_v14 }
  0x71   :  { %1658 = vmatpush3.bf16.msra.mxu0 %v2015_v11  ;;  %1683 = vmatprep.subr.bf16.mxu1 %v2253_v0 }
  0x72   :  { %1659 = vmatprep.subr.bf16.mxu0 %v2017_v17 }
  0x74   :  { %1684 = vmatpush3.bf16.msra.mxu1 %v2405_v18 }
  0x75   :  { %1660 = vmatpush3.bf16.msra.mxu0 %v2017_v17  ;;  %1685 = vmatprep.subr.bf16.mxu1 %v2253_v0 }
  0x76   :  { %1661 = vmatprep.subr.bf16.mxu0 %v2019_v19 }
  0x78   :  { %1686 = vmatpush3.bf16.msra.mxu1 %v2408_v20 }
  0x79   :  { %1662 = vmatpush3.bf16.msra.mxu0 %v2019_v19  ;;  %1711 = vmatprep.subr.bf16.mxu1 %v2253_v0 }
  0x7a   :  { %1691 = vmatprep.subr.bf16.mxu0 %v2253_v0 }
  0x7b   :  { %1688 = vmatmul.mubr.bf16.vlgmr.msra.gmra.mrb[0].mxu1 %v284_v24 }
  0x7c   :  { %1664 = vmatmul.mubr.bf16.vlgmr.msra.gmra.mrb[0].mxu0 %v106_v25  ;;  %1712 = vmatpush3.bf16.msra.mxu1 %v2378_v2 }
  0x7d   :  { %1727 = vmatprep.mubr.msk.bf16.mxu1 %vm2254_vm0, %v2253_v0  ;;  %1713 = vmatprep.subr.bf16.mxu1 %v2253_v0 }
  0x7e   :  { %1692 = vmatpush3.bf16.msra.mxu0 %v2451_v47  ;;  %1667 = vmatprep.mubr.bf16.mxu0 %v107_v52 }
  0x7f   :  { %1693 = vmatprep.subr.bf16.mxu0 %v2253_v0 }
  0x80   :  { %1714 = vmatpush3.bf16.msra.mxu1 %v2381_v4 }
  0x81   :  { %1715 = vmatprep.subr.bf16.mxu1 %v2253_v0 }
  0x82   :  { %1694 = vmatpush3.bf16.msra.mxu0 %v2453_v48 }
  0x83   :  { %1695 = vmatprep.subr.bf16.mxu0 %v2253_v0 }
  0x84   :  { %1716 = vmatpush3.bf16.msra.mxu1 %v2385_v6  ;;  %1668 = vmatmul.mubr.bf16.gmra.mrb[4].mxu0 %v108_v54 }
  0x85   :  { %1717 = vmatprep.subr.bf16.mxu1 %v2253_v0  ;;  %1707 = vmatprep.mubr.msk.bf16.mxu0 %vm2254_vm0, %v2253_v0 }
  0x86   :  { %1696 = vmatpush3.bf16.msra.mxu0 %v2458_v55 }
  0x87   :  { %1697 = vmatprep.subr.bf16.mxu0 %v2253_v0 }
  0x88   :  { %1718 = vmatpush3.bf16.msra.mxu1 %v2389_v8 }
  0x89   :  { %1719 = vmatprep.subr.bf16.mxu1 %v2253_v0 }
  0x8a   :  { %1698 = vmatpush3.bf16.msra.mxu0 %v2465_v57 }
  0x8b   :  { %1699 = vmatprep.subr.bf16.mxu0 %v2253_v0 }
  0x8c   :  { %1720 = vmatpush3.bf16.msra.mxu1 %v2393_v10 }
  0x8d   :  { %1721 = vmatprep.subr.bf16.mxu1 %v2253_v0 }
  0x8e   :  { %1700 = vmatpush3.bf16.msra.mxu0 %v2469_v58 }
  0x8f   :  { %1701 = vmatprep.subr.bf16.mxu0 %v2253_v0 }
  0x90   :  { %1722 = vmatpush3.bf16.msra.mxu1 %v2396_v14 }
  0x91   :  { %1723 = vmatprep.subr.bf16.mxu1 %v2253_v0 }
  0x92   :  { %1702 = vmatpush3.bf16.msra.mxu0 %v2473_v59 }
  0x93   :  { %1703 = vmatprep.subr.bf16.mxu0 %v2253_v0 }
  0x94   :  { %1724 = vmatpush3.bf16.msra.mxu1 %v2405_v18 }
  0x95   :  { %1725 = vmatprep.subr.bf16.mxu1 %v2253_v0 }
  0x96   :  { %1704 = vmatpush3.bf16.msra.mxu0 %v2477_v60 }
  0x97   :  { %1705 = vmatprep.subr.bf16.mxu0 %v2253_v0 }
  0x98   :  { %1726 = vmatpush3.bf16.msra.mxu1 %v2408_v20 }
  0x99   :  { %1751 = vmatprep.subr.bf16.mxu1 %v2253_v0 }
  0x9a   :  { %1706 = vmatpush3.bf16.msra.mxu0 %v2481_v61 }
  0x9b   :  { %1731 = vmatprep.subr.bf16.mxu0 %v2253_v0 }
  0xd2   :  { %v2433_v26 = vpop.permute.xlu0 %380 }
 0x14e   :  { %v367_v27 = vpop.f32.mrb[0].mxu1 }
 0x14f   :  { %v2435_v28 = vpop.f32.mrb[0].mxu0  ;;  %v1689_v29 = vpop.f32.mrb[1].mxu1  ;;  %v383_v31 = vadd.f32 %v2433_v26, %v367_v27 }
 0x150   :  { %v214_v30 = vpop.f32.mrb[1].mxu0  ;;  %v370_v32 = vpop.f32.mrb[2].mxu1 }
 0x151   :  { %v2438_v33 = vpop.f32.mrb[2].mxu0  ;;  %385 = vrot.lane.b32.xlu0 %v383_v31, %s2247_s28  ;;  %v1690_v34 = vpop.f32.mrb[3].mxu1  ;;  %v215_v37 = vadd.f32 %v2447_v36, %v214_v30 }
 0x152   :  { %v2441_v35 = vpop.f32.mrb[3].mxu0 }
 0x153   :  { %v373_v38 = vadd.f32 %v367_v27, %v215_v37  ;;  %v218_v31 = vadd.f32 %v2447_v36, %v2441_v35 }
 0x155   :  { %402 = vrot.lane.b32.xlu0 %v283_v21, %s2255_s5  ;;  %v1429_v39 = vmul.f32 -1.442695, %v373_v38 }
 0x157   :  { %2029 = vpow2.f32 %v1429_v39  ;;  %v2487_v9 = vpop.f32.mrb[4].mxu0 }
 0x158   :  { %v2489_v11 = vpop.f32.mrb[5].mxu0 }
 0x159   :  { %v2491_v12 = vpop.f32.mrb[6].mxu0 }
 0x15a   :  { %v2493_v13 = vpop.f32.mrb[7].mxu0 }
 0x161   :  { %v2030_v40 = vpop.eup %2029 }
 0x162   :  { %v377_v41 = vadd.f32 1.0, %v2030_v40 }
 0x164   :  { %2031 = vrcp.f32 %v377_v41 }
 0x16e   :  { %v2032_v42 = vpop.eup %2031 }
 0x16f   :  { %v395_v63 = vsub.f32 1.0, %v2032_v42 }
 0x1c3   :  { %v386_v43 = vpop.permute.xlu0 %385 }
 0x1c4   :  { %v388_v44 = vmul.f32 %v2032_v42, %v386_v43 }
 0x1c6   :  { %390 = vrot.lane.b32.xlu1 %v388_v44, %s2247_s28 }
 0x1c7   :  { %v403_v62 = vpop.permute.xlu0 %402 }
 0x1c8   :  { %v405_v3 = vmul.f32 %v2032_v42, %v403_v62 }
 0x238   :  { %v391_v45 = vpop.permute.xlu1 %390 }
 0x239   :  { %v393_v46 = vadd.f32 %v391_v45, %v215_v37 }
 0x23b   :  { %2033 = vtanh.f32 %v393_v46 }
 0x245   :  { %v2034_v56 = vpop.eup %2033 }
 0x246   :  { %397 = vrot.lane.b32.xlu1 %v2034_v56, %s2256_s26 }
 0x2b8   :  { %v398_v1 = vpop.permute.xlu1 %397 }
 0x2b9   :  { %v400_v5 = vmul.f32 %v398_v1, %v395_v63 }
 0x2bb   :  { %v406_v7 = vadd.f32 %v405_v3, %v400_v5 }
 0x2bd   :  { %408 = vrot.lane.b32.xlu1 %v406_v7, %s2256_s26 }
 0x32f   :  { %v409_v15 = vpop.permute.xlu1 %408 }
 0x330   :  { %v1439_v17 = vpack.c.bf16 %v409_v15, %v409_v15  ;;  %v412_v42 = vsel %vm411_vm1, %v409_v15, 0.0 }
 0x332   :  { %1708 = vmatmul.mubr.msk.bf16.vlgmr.msra.gmra.mrb[8].mxu0 %vm2497_vm2, %v1439_v17  ;;  %1728 = vmatmul.mubr.msk.bf16.vlgmr.msra.gmra.mrb[4].mxu1 %vm2497_vm2, %v1439_v17 }
 0x333   :  { %1732 = vmatpush3.bf16.msra.mxu0 %v2451_v47  ;;  %1752 = vmatpush3.bf16.msra.mxu1 %v2378_v2 }
 0x334   :  { %1733 = vmatprep.subr.bf16.mxu0 %v2253_v0  ;;  %1753 = vmatprep.subr.bf16.mxu1 %v2253_v0 }
 0x335   :  { %1747 = vmatprep.mubr.msk.bf16.mxu0 %vm2254_vm0, %v2253_v0  ;;  %1767 = vmatprep.mubr.msk.bf16.mxu1 %vm2254_vm0, %v2253_v0 }
 0x337   :  { %1734 = vmatpush3.bf16.msra.mxu0 %v2453_v48  ;;  %1754 = vmatpush3.bf16.msra.mxu1 %v2381_v4 }
 0x338   :  { %1735 = vmatprep.subr.bf16.mxu0 %v2253_v0  ;;  %1755 = vmatprep.subr.bf16.mxu1 %v2253_v0 }
 0x33b   :  { %1736 = vmatpush3.bf16.msra.mxu0 %v2458_v55  ;;  %1756 = vmatpush3.bf16.msra.mxu1 %v2385_v6 }
 0x33c   :  { %1737 = vmatprep.subr.bf16.mxu0 %v2253_v0  ;;  %1757 = vmatprep.subr.bf16.mxu1 %v2253_v0 }
 0x33f   :  { %1738 = vmatpush3.bf16.msra.mxu0 %v2465_v57  ;;  %1758 = vmatpush3.bf16.msra.mxu1 %v2389_v8 }
 0x340   :  { %1739 = vmatprep.subr.bf16.mxu0 %v2253_v0  ;;  %1759 = vmatprep.subr.bf16.mxu1 %v2253_v0 }
 0x343   :  { %1740 = vmatpush3.bf16.msra.mxu0 %v2469_v58  ;;  %1760 = vmatpush3.bf16.msra.mxu1 %v2393_v10 }
 0x344   :  { %1741 = vmatprep.subr.bf16.mxu0 %v2253_v0  ;;  %1761 = vmatprep.subr.bf16.mxu1 %v2253_v0 }
 0x347   :  { %1742 = vmatpush3.bf16.msra.mxu0 %v2473_v59  ;;  %1762 = vmatpush3.bf16.msra.mxu1 %v2396_v14 }
 0x348   :  { %1743 = vmatprep.subr.bf16.mxu0 %v2253_v0  ;;  %1763 = vmatprep.subr.bf16.mxu1 %v2253_v0 }
 0x34b   :  { %1744 = vmatpush3.bf16.msra.mxu0 %v2477_v60  ;;  %1764 = vmatpush3.bf16.msra.mxu1 %v2405_v18 }
 0x34c   :  { %1745 = vmatprep.subr.bf16.mxu0 %v2253_v0  ;;  %1765 = vmatprep.subr.bf16.mxu1 %v2253_v0 }
 0x34f   :  { %1746 = vmatpush3.bf16.msra.mxu0 %v2481_v61  ;;  %1766 = vmatpush3.bf16.msra.mxu1 %v2408_v20 }
 0x350   :  { %1771 = vmatprep.subr.bf16.mxu0 %v2253_v0  ;;  %1791 = vmatprep.subr.bf16.mxu1 %v2253_v0 }
 0x405   :  { %v2541_v19 = vpop.f32.mrb[8].mxu0  ;;  %v536_v21 = vpop.f32.mrb[4].mxu1 }
 0x406   :  { %v1709_v22 = vpop.f32.mrb[9].mxu0  ;;  %v1729_v23 = vpop.f32.mrb[5].mxu1  ;;  %v549_v24 = vadd.f32 %v536_v21, %v2433_v26  ;;  %v542_v32 = vadd.f32 %v536_v21, %v218_v31  ;;  %v223_v21 = vadd.f32 %v2435_v28, %v2447_v36 }
 0x407   :  { %v499_v25 = vpop.f32.mrb[10].mxu0  ;;  %v539_v27 = vpop.f32.mrb[6].mxu1 }
 0x408   :  { %551 = vrot.lane.b32.xlu0 %v549_v24, %s2247_s28  ;;  %v1710_v29 = vpop.f32.mrb[11].mxu0  ;;  %v1730_v30 = vpop.f32.mrb[7].mxu1  ;;  %v1444_v34 = vmul.f32 -1.442695, %v542_v32 }
 0x40a   :  { %2035 = vpow2.f32 %v1444_v34 }
 0x414   :  { %v2036_v37 = vpop.eup %2035 }
 0x415   :  { %v546_v38 = vadd.f32 1.0, %v2036_v37 }
 0x417   :  { %2037 = vrcp.f32 %v546_v38 }
 0x421   :  { %v2038_v39 = vpop.eup %2037 }
 0x422   :  { %v561_v46 = vsub.f32 1.0, %v2038_v39 }
 0x47a   :  { %v552_v40 = vpop.permute.xlu0 %551 }
 0x47b   :  { %v554_v41 = vmul.f32 %v2038_v39, %v552_v40 }
 0x47d   :  { %556 = vrot.lane.b32.xlu1 %v554_v41, %s2247_s28 }
 0x481   :  { %568 = vrot.lane.b32.xlu1 %v412_v42, %s2255_s5 }
 0x4ef   :  { %v557_v43 = vpop.permute.xlu1 %556 }
 0x4f0   :  { %v559_v44 = vadd.f32 %v557_v43, %v218_v31 }
 0x4f2   :  { %2039 = vtanh.f32 %v559_v44 }
 0x4f3   :  { %v569_v35 = vpop.permute.xlu1 %568 }
 0x4f4   :  { %v571_v50 = vmul.f32 %v2038_v39, %v569_v35 }
 0x4fc   :  { %v2040_v45 = vpop.eup %2039 }
 0x4fd   :  { %563 = vrot.lane.b32.xlu0 %v2040_v45, %s2256_s26 }
 0x56f   :  { %v564_v49 = vpop.permute.xlu0 %563 }
 0x570   :  { %v566_v51 = vmul.f32 %v564_v49, %v561_v46 }
 0x572   :  { %v572_v52 = vadd.f32 %v571_v50, %v566_v51 }
 0x574   :  { %574 = vrot.lane.b32.xlu0 %v572_v52, %s2256_s26 }
 0x5e6   :  { %v575_v53 = vpop.permute.xlu0 %574 }
 0x5e7   :  { %v1446_v54 = vpack.c.bf16 %v575_v53, %v575_v53  ;;  %v577_v31 = vsel %vm411_vm1, %v575_v53, 0.0 }
 0x5e9   :  { %1748 = vmatmul.mubr.msk.bf16.vlgmr.msra.gmra.mrb[12].mxu0 %vm2497_vm2, %v1446_v54  ;;  %1768 = vmatmul.mubr.msk.bf16.vlgmr.msra.gmra.mrb[8].mxu1 %vm2497_vm2, %v1446_v54 }
 0x5ea   :  { %1772 = vmatpush3.bf16.msra.mxu0 %v2451_v47  ;;  %1792 = vmatpush3.bf16.msra.mxu1 %v2378_v2 }
 0x5eb   :  { %1773 = vmatprep.subr.bf16.mxu0 %v2253_v0  ;;  %1793 = vmatprep.subr.bf16.mxu1 %v2253_v0 }
 0x5ec   :  { %1787 = vmatprep.mubr.msk.bf16.mxu0 %vm2254_vm0, %v2253_v0  ;;  %1807 = vmatprep.mubr.msk.bf16.mxu1 %vm2254_vm0, %v2253_v0 }
 0x5ee   :  { %1774 = vmatpush3.bf16.msra.mxu0 %v2453_v48  ;;  %1794 = vmatpush3.bf16.msra.mxu1 %v2381_v4 }
 0x5ef   :  { %1775 = vmatprep.subr.bf16.mxu0 %v2253_v0  ;;  %1795 = vmatprep.subr.bf16.mxu1 %v2253_v0 }
 0x5f2   :  { %1776 = vmatpush3.bf16.msra.mxu0 %v2458_v55  ;;  %1796 = vmatpush3.bf16.msra.mxu1 %v2385_v6 }
 0x5f3   :  { %1777 = vmatprep.subr.bf16.mxu0 %v2253_v0  ;;  %1797 = vmatprep.subr.bf16.mxu1 %v2253_v0 }
 0x5f6   :  { %1778 = vmatpush3.bf16.msra.mxu0 %v2465_v57  ;;  %1798 = vmatpush3.bf16.msra.mxu1 %v2389_v8 }
 0x5f7   :  { %1779 = vmatprep.subr.bf16.mxu0 %v2253_v0  ;;  %1799 = vmatprep.subr.bf16.mxu1 %v2253_v0 }
 0x5fa   :  { %1780 = vmatpush3.bf16.msra.mxu0 %v2469_v58  ;;  %1800 = vmatpush3.bf16.msra.mxu1 %v2393_v10 }
 0x5fb   :  { %1781 = vmatprep.subr.bf16.mxu0 %v2253_v0  ;;  %1801 = vmatprep.subr.bf16.mxu1 %v2253_v0 }
 0x5fe   :  { %1782 = vmatpush3.bf16.msra.mxu0 %v2473_v59  ;;  %1802 = vmatpush3.bf16.msra.mxu1 %v2396_v14 }
 0x5ff   :  { %1783 = vmatprep.subr.bf16.mxu0 %v2253_v0  ;;  %1803 = vmatprep.subr.bf16.mxu1 %v2253_v0 }
 0x602   :  { %1784 = vmatpush3.bf16.msra.mxu0 %v2477_v60  ;;  %1804 = vmatpush3.bf16.msra.mxu1 %v2405_v18 }
 0x603   :  { %1785 = vmatprep.subr.bf16.mxu0 %v2253_v0  ;;  %1805 = vmatprep.subr.bf16.mxu1 %v2253_v0 }
 0x606   :  { %1786 = vmatpush3.bf16.msra.mxu0 %v2481_v61  ;;  %1806 = vmatpush3.bf16.msra.mxu1 %v2408_v20 }
 0x607   :  { %1811 = vmatprep.subr.bf16.mxu0 %v2253_v0  ;;  %1831 = vmatprep.subr.bf16.mxu1 %v2253_v0 }
 0x6bc   :  { %v2592_v56 = vpop.f32.mrb[12].mxu0  ;;  %v653_v62 = vpop.f32.mrb[8].mxu1 }
 0x6bd   :  { %v1749_v63 = vpop.f32.mrb[13].mxu0  ;;  %v1769_v1 = vpop.f32.mrb[9].mxu1  ;;  %v666_v3 = vadd.f32 %v653_v62, %v2433_v26  ;;  %v659_v22 = vadd.f32 %v653_v62, %v223_v21  ;;  %v226_v62 = vadd.f32 %v2438_v33, %v2447_v36 }
 0x6be   :  { %v616_v5 = vpop.f32.mrb[14].mxu0  ;;  %v656_v7 = vpop.f32.mrb[10].mxu1 }
 0x6bf   :  { %668 = vrot.lane.b32.xlu1 %v666_v3, %s2247_s28  ;;  %v1750_v15 = vpop.f32.mrb[15].mxu0  ;;  %v1770_v17 = vpop.f32.mrb[11].mxu1  ;;  %v1451_v23 = vmul.f32 -1.442695, %v659_v22 }
 0x6c1   :  { %2041 = vpow2.f32 %v1451_v23 }
 0x6cb   :  { %v2042_v24 = vpop.eup %2041 }
 0x6cc   :  { %v663_v25 = vadd.f32 1.0, %v2042_v24 }
 0x6ce   :  { %2043 = vrcp.f32 %v663_v25 }
 0x6d8   :  { %v2044_v27 = vpop.eup %2043 }
 0x6d9   :  { %v678_v38 = vsub.f32 1.0, %v2044_v27 }
 0x731   :  { %v669_v29 = vpop.permute.xlu1 %668 }
 0x732   :  { %v671_v30 = vmul.f32 %v2044_v27, %v669_v29 }
 0x734   :  { %673 = vrot.lane.b32.xlu0 %v671_v30, %s2247_s28 }
 0x738   :  { %685 = vrot.lane.b32.xlu0 %v577_v31, %s2255_s5 }
 0x7a6   :  { %v674_v32 = vpop.permute.xlu0 %673 }
 0x7a7   :  { %v676_v34 = vadd.f32 %v674_v32, %v223_v21 }
 0x7a9   :  { %2045 = vtanh.f32 %v676_v34 }
 0x7aa   :  { %v686_v28 = vpop.permute.xlu0 %685 }
 0x7ab   :  { %v688_v40 = vmul.f32 %v2044_v27, %v686_v28 }
 0x7b3   :  { %v2046_v37 = vpop.eup %2045 }
 0x7b4   :  { %680 = vrot.lane.b32.xlu1 %v2046_v37, %s2256_s26 }
 0x826   :  { %v681_v39 = vpop.permute.xlu1 %680 }
 0x827   :  { %v683_v41 = vmul.f32 %v681_v39, %v678_v38 }
 0x829   :  { %v689_v42 = vadd.f32 %v688_v40, %v683_v41 }
 0x82b   :  { %691 = vrot.lane.b32.xlu1 %v689_v42, %s2256_s26 }
 0x89d   :  { %v692_v43 = vpop.permute.xlu1 %691 }
 0x89e   :  { %v1453_v44 = vpack.c.bf16 %v692_v43, %v692_v43  ;;  %v694_v21 = vsel %vm411_vm1, %v692_v43, 0.0 }
 0x8a0   :  { %1788 = vmatmul.mubr.msk.bf16.vlgmr.msra.gmra.mrb[16].mxu0 %vm2497_vm2, %v1453_v44  ;;  %1808 = vmatmul.mubr.msk.bf16.vlgmr.msra.gmra.mrb[12].mxu1 %vm2497_vm2, %v1453_v44 }
 0x8a1   :  { %1812 = vmatpush3.bf16.msra.mxu0 %v2451_v47  ;;  %1832 = vmatpush3.bf16.msra.mxu1 %v2378_v2 }
 0x8a2   :  { %1813 = vmatprep.subr.bf16.mxu0 %v2253_v0  ;;  %1833 = vmatprep.subr.bf16.mxu1 %v2253_v0 }
 0x8a3   :  { %1827 = vmatprep.mubr.msk.bf16.mxu0 %vm2254_vm0, %v2253_v0  ;;  %1847 = vmatprep.mubr.msk.bf16.mxu1 %vm2254_vm0, %v2253_v0 }
 0x8a5   :  { %1814 = vmatpush3.bf16.msra.mxu0 %v2453_v48  ;;  %1834 = vmatpush3.bf16.msra.mxu1 %v2381_v4 }
 0x8a6   :  { %1815 = vmatprep.subr.bf16.mxu0 %v2253_v0  ;;  %1835 = vmatprep.subr.bf16.mxu1 %v2253_v0 }
 0x8a9   :  { %1816 = vmatpush3.bf16.msra.mxu0 %v2458_v55  ;;  %1836 = vmatpush3.bf16.msra.mxu1 %v2385_v6 }
 0x8aa   :  { %1817 = vmatprep.subr.bf16.mxu0 %v2253_v0  ;;  %1837 = vmatprep.subr.bf16.mxu1 %v2253_v0 }
 0x8ad   :  { %1818 = vmatpush3.bf16.msra.mxu0 %v2465_v57  ;;  %1838 = vmatpush3.bf16.msra.mxu1 %v2389_v8 }
 0x8ae   :  { %1819 = vmatprep.subr.bf16.mxu0 %v2253_v0  ;;  %1839 = vmatprep.subr.bf16.mxu1 %v2253_v0 }
 0x8b1   :  { %1820 = vmatpush3.bf16.msra.mxu0 %v2469_v58  ;;  %1840 = vmatpush3.bf16.msra.mxu1 %v2393_v10 }
 0x8b2   :  { %1821 = vmatprep.subr.bf16.mxu0 %v2253_v0  ;;  %1841 = vmatprep.subr.bf16.mxu1 %v2253_v0 }
 0x8b5   :  { %1822 = vmatpush3.bf16.msra.mxu0 %v2473_v59  ;;  %1842 = vmatpush3.bf16.msra.mxu1 %v2396_v14 }
 0x8b6   :  { %1823 = vmatprep.subr.bf16.mxu0 %v2253_v0  ;;  %1843 = vmatprep.subr.bf16.mxu1 %v2253_v0 }
 0x8b9   :  { %1824 = vmatpush3.bf16.msra.mxu0 %v2477_v60  ;;  %1844 = vmatpush3.bf16.msra.mxu1 %v2405_v18 }
 0x8ba   :  { %1825 = vmatprep.subr.bf16.mxu0 %v2253_v0  ;;  %1845 = vmatprep.subr.bf16.mxu1 %v2253_v0 }
 0x8bd   :  { %1826 = vmatpush3.bf16.msra.mxu0 %v2481_v61  ;;  %1846 = vmatpush3.bf16.msra.mxu1 %v2408_v20 }
 0x8be   :  { %1851 = vmatprep.subr.bf16.mxu0 %v2253_v0  ;;  %1871 = vmatprep.subr.bf16.mxu1 %v2253_v0 }
 0x973   :  { %v2643_v45 = vpop.f32.mrb[16].mxu0  ;;  %v770_v35 = vpop.f32.mrb[12].mxu1 }
 0x974   :  { %v1789_v46 = vpop.f32.mrb[17].mxu0  ;;  %v1809_v49 = vpop.f32.mrb[13].mxu1  ;;  %v783_v50 = vadd.f32 %v770_v35, %v2433_v26  ;;  %v776_v63 = vadd.f32 %v770_v35, %v226_v62  ;;  %v231_v35 = vadd.f32 %v2447_v36, %v2489_v11 }
 0x975   :  { %v733_v51 = vpop.f32.mrb[18].mxu0  ;;  %v773_v52 = vpop.f32.mrb[14].mxu1 }
 0x976   :  { %785 = vrot.lane.b32.xlu0 %v783_v50, %s2247_s28  ;;  %v1790_v53 = vpop.f32.mrb[19].mxu0  ;;  %v1810_v54 = vpop.f32.mrb[15].mxu1  ;;  %v1458_v1 = vmul.f32 -1.442695, %v776_v63 }
 0x978   :  { %2047 = vpow2.f32 %v1458_v1 }
 0x982   :  { %v2048_v3 = vpop.eup %2047 }
 0x983   :  { %v780_v5 = vadd.f32 1.0, %v2048_v3 }
 0x985   :  { %2049 = vrcp.f32 %v780_v5 }
 0x98f   :  { %v2050_v7 = vpop.eup %2049 }
 0x990   :  { %v795_v25 = vsub.f32 1.0, %v2050_v7 }
 0x9e8   :  { %v786_v15 = vpop.permute.xlu0 %785 }
 0x9e9   :  { %v788_v17 = vmul.f32 %v2050_v7, %v786_v15 }
 0x9eb   :  { %790 = vrot.lane.b32.xlu1 %v788_v17, %s2247_s28 }
 0x9ef   :  { %802 = vrot.lane.b32.xlu1 %v694_v21, %s2255_s5 }
 0xa5d   :  { %v791_v22 = vpop.permute.xlu1 %790 }
 0xa5e   :  { %v793_v23 = vadd.f32 %v791_v22, %v226_v62 }
 0xa60   :  { %2051 = vtanh.f32 %v793_v23 }
 0xa61   :  { %v803_v33 = vpop.permute.xlu1 %802 }
 0xa62   :  { %v805_v29 = vmul.f32 %v2050_v7, %v803_v33 }
 0xa6a   :  { %v2052_v24 = vpop.eup %2051 }
 0xa6b   :  { %797 = vrot.lane.b32.xlu0 %v2052_v24, %s2256_s26 }
 0xadd   :  { %v798_v27 = vpop.permute.xlu0 %797 }
 0xade   :  { %v800_v30 = vmul.f32 %v798_v27, %v795_v25 }
 0xae0   :  { %v806_v31 = vadd.f32 %v805_v29, %v800_v30 }
 0xae2   :  { %808 = vrot.lane.b32.xlu0 %v806_v31, %s2256_s26 }
 0xb54   :  { %v809_v32 = vpop.permute.xlu0 %808 }
 0xb55   :  { %v1460_v34 = vpack.c.bf16 %v809_v32, %v809_v32  ;;  %v811_v62 = vsel %vm411_vm1, %v809_v32, 0.0 }
 0xb57   :  { %1828 = vmatmul.mubr.msk.bf16.vlgmr.msra.gmra.mrb[20].mxu0 %vm2497_vm2, %v1460_v34  ;;  %1848 = vmatmul.mubr.msk.bf16.vlgmr.msra.gmra.mrb[16].mxu1 %vm2497_vm2, %v1460_v34 }
 0xb58   :  { %1852 = vmatpush3.bf16.msra.mxu0 %v2451_v47  ;;  %1872 = vmatpush3.bf16.msra.mxu1 %v2378_v2 }
 0xb59   :  { %1853 = vmatprep.subr.bf16.mxu0 %v2253_v0  ;;  %1873 = vmatprep.subr.bf16.mxu1 %v2253_v0 }
 0xb5a   :  { %1867 = vmatprep.mubr.msk.bf16.mxu0 %vm2254_vm0, %v2253_v0  ;;  %1887 = vmatprep.mubr.msk.bf16.mxu1 %vm2254_vm0, %v2253_v0 }
 0xb5c   :  { %1854 = vmatpush3.bf16.msra.mxu0 %v2453_v48  ;;  %1874 = vmatpush3.bf16.msra.mxu1 %v2381_v4 }
 0xb5d   :  { %1855 = vmatprep.subr.bf16.mxu0 %v2253_v0  ;;  %1875 = vmatprep.subr.bf16.mxu1 %v2253_v0 }
 0xb60   :  { %1856 = vmatpush3.bf16.msra.mxu0 %v2458_v55  ;;  %1876 = vmatpush3.bf16.msra.mxu1 %v2385_v6 }
 0xb61   :  { %1857 = vmatprep.subr.bf16.mxu0 %v2253_v0  ;;  %1877 = vmatprep.subr.bf16.mxu1 %v2253_v0 }
 0xb64   :  { %1858 = vmatpush3.bf16.msra.mxu0 %v2465_v57  ;;  %1878 = vmatpush3.bf16.msra.mxu1 %v2389_v8 }
 0xb65   :  { %1859 = vmatprep.subr.bf16.mxu0 %v2253_v0  ;;  %1879 = vmatprep.subr.bf16.mxu1 %v2253_v0 }
 0xb68   :  { %1860 = vmatpush3.bf16.msra.mxu0 %v2469_v58  ;;  %1880 = vmatpush3.bf16.msra.mxu1 %v2393_v10 }
 0xb69   :  { %1861 = vmatprep.subr.bf16.mxu0 %v2253_v0  ;;  %1881 = vmatprep.subr.bf16.mxu1 %v2253_v0 }
 0xb6c   :  { %1862 = vmatpush3.bf16.msra.mxu0 %v2473_v59  ;;  %1882 = vmatpush3.bf16.msra.mxu1 %v2396_v14 }
 0xb6d   :  { %1863 = vmatprep.subr.bf16.mxu0 %v2253_v0  ;;  %1883 = vmatprep.subr.bf16.mxu1 %v2253_v0 }
 0xb70   :  { %1864 = vmatpush3.bf16.msra.mxu0 %v2477_v60  ;;  %1884 = vmatpush3.bf16.msra.mxu1 %v2405_v18 }
 0xb71   :  { %1865 = vmatprep.subr.bf16.mxu0 %v2253_v0  ;;  %1885 = vmatprep.subr.bf16.mxu1 %v2253_v0 }
 0xb74   :  { %1866 = vmatpush3.bf16.msra.mxu0 %v2481_v61  ;;  %1886 = vmatpush3.bf16.msra.mxu1 %v2408_v20 }
 0xb75   :  { %1891 = vmatprep.subr.bf16.mxu0 %v2253_v0  ;;  %1911 = vmatprep.subr.bf16.mxu1 %v2253_v0 }
 0xc2a   :  { %v2694_v37 = vpop.f32.mrb[20].mxu0  ;;  %v887_v28 = vpop.f32.mrb[16].mxu1 }
 0xc2b   :  { %v1829_v38 = vpop.f32.mrb[21].mxu0  ;;  %v1849_v39 = vpop.f32.mrb[17].mxu1  ;;  %v900_v40 = vadd.f32 %v887_v28, %v2433_v26  ;;  %v893_v46 = vadd.f32 %v887_v28, %v231_v35 }
 0xc2c   :  { %v850_v41 = vpop.f32.mrb[22].mxu0  ;;  %v890_v42 = vpop.f32.mrb[18].mxu1 }
 0xc2d   :  { %902 = vrot.lane.b32.xlu1 %v900_v40, %s2247_s28  ;;  %v1830_v43 = vpop.f32.mrb[23].mxu0  ;;  %v1850_v44 = vpop.f32.mrb[19].mxu1  ;;  %v1465_v49 = vmul.f32 -1.442695, %v893_v46 }
 0xc2f   :  { %2053 = vpow2.f32 %v1465_v49 }
 0xc39   :  { %v2054_v50 = vpop.eup %2053 }
 0xc3a   :  { %v897_v51 = vadd.f32 1.0, %v2054_v50 }
 0xc3c   :  { %2055 = vrcp.f32 %v897_v51 }
 0xc46   :  { %v2056_v52 = vpop.eup %2055 }
 0xc47   :  { %v912_v5 = vsub.f32 1.0, %v2056_v52 }
 0xc9f   :  { %v903_v53 = vpop.permute.xlu1 %902 }
 0xca0   :  { %v905_v54 = vmul.f32 %v2056_v52, %v903_v53  ;;  %v2095_v53 = vld [vmem:[#allocation8] sm:$0xff]  }
 0xca2   :  { %907 = vrot.lane.b32.xlu0 %v905_v54, %s2247_s28  ;;  %v2096_v54 = vld [vmem:[#allocation8 + $0x8] sm:$0xff]  }
 0xca6   :  { %919 = vrot.lane.b32.xlu0 %v811_v62, %s2255_s5  ;;  %v2097_v62 = vld [vmem:[#allocation8 + $0x10] sm:$0xff]  }
 0xd14   :  { %v908_v63 = vpop.permute.xlu0 %907 }
 0xd15   :  { %v910_v1 = vadd.f32 %v908_v63, %v231_v35  ;;  %v2098_v63 = vld [vmem:[#allocation8 + $0x18] sm:$0xff]  }
 0xd17   :  { %2057 = vtanh.f32 %v910_v1  ;;  %v2099_v1 = vld [vmem:[#allocation8 + $0x20] sm:$0xff]  }
 0xd18   :  { %v920_v11 = vpop.permute.xlu0 %919 }
 0xd19   :  { %v922_v15 = vmul.f32 %v2056_v52, %v920_v11  ;;  %v2101_v11 = vld [vmem:[#allocation8 + $0x30] sm:$0xff]  }
 0xd21   :  { %v2058_v3 = vpop.eup %2057 }
 0xd22   :  { %914 = vrot.lane.b32.xlu1 %v2058_v3, %s2256_s26  ;;  %v2100_v3 = vld [vmem:[#allocation8 + $0x28] sm:$0xff]  }
 0xd94   :  { %v915_v7 = vpop.permute.xlu1 %914 }
 0xd95   :  { %v917_v17 = vmul.f32 %v915_v7, %v912_v5  ;;  %v2102_v5 = vld [vmem:[#allocation8 + $0x38] sm:$0xff]  }
 0xd97   :  { %v923_v21 = vadd.f32 %v922_v15, %v917_v17 }
 0xd99   :  { %925 = vrot.lane.b32.xlu1 %v923_v21, %s2256_s26 }
 0xe0b   :  { %v2705_v22 = vpop.permute.xlu1 %925 }
 0xe0c   :  { %v1467_v23 = vpack.c.bf16 %v2705_v22, %v2705_v22  ;;  %v928_v40 = vsel %vm411_vm1, %v2705_v22, 0.0 }
 0xe0e   :  { %1868 = vmatmul.mubr.msk.bf16.vlgmr.msra.gmra.mrb[24].mxu0 %vm2497_vm2, %v1467_v23  ;;  %1888 = vmatmul.mubr.msk.bf16.vlgmr.msra.gmra.mrb[20].mxu1 %vm2497_vm2, %v1467_v23 }
 0xe0f   :  { %1892 = vmatpush3.bf16.msra.mxu0 %v2451_v47  ;;  %1912 = vmatpush3.bf16.msra.mxu1 %v2378_v2  ;;  %v2752_v2 = vld [vmem:[%s2899_s7] ss:$0 sm:$0xff] }
 0xe10   :  { %1893 = vmatprep.subr.bf16.mxu0 %v2253_v0  ;;  %1913 = vmatprep.subr.bf16.mxu1 %v2253_v0  ;;  %v2810_v17 = vadd.f32 %v2752_v2, %v2592_v56 }
 0xe11   :  { %1907 = vmatprep.mubr.msk.bf16.mxu0 %vm2254_vm0, %v2253_v0  ;;  %1927 = vmatprep.mubr.msk.bf16.mxu1 %vm2254_vm0, %v2253_v0 }
 0xe13   :  { %1894 = vmatpush3.bf16.msra.mxu0 %v2453_v48  ;;  %1914 = vmatpush3.bf16.msra.mxu1 %v2381_v4 }
 0xe14   :  { %1895 = vmatprep.subr.bf16.mxu0 %v2253_v0  ;;  %1915 = vmatprep.subr.bf16.mxu1 %v2253_v0 }
 0xe17   :  { %1896 = vmatpush3.bf16.msra.mxu0 %v2458_v55  ;;  %1916 = vmatpush3.bf16.msra.mxu1 %v2385_v6 }
 0xe18   :  { %1897 = vmatprep.subr.bf16.mxu0 %v2253_v0  ;;  %1917 = vmatprep.subr.bf16.mxu1 %v2253_v0 }
 0xe1b   :  { %1898 = vmatpush3.bf16.msra.mxu0 %v2465_v57  ;;  %1918 = vmatpush3.bf16.msra.mxu1 %v2389_v8  ;;  %v2756_v8 = vadd.f32 %v2752_v2, %v2541_v19  ;;  %v234_v19 = vadd.f32 %v2447_v36, %v2493_v13 }
 0xe1c   :  { %1899 = vmatprep.subr.bf16.mxu0 %v2253_v0  ;;  %1919 = vmatprep.subr.bf16.mxu1 %v2253_v0 }
 0xe1f   :  { %1900 = vmatpush3.bf16.msra.mxu0 %v2469_v58  ;;  %1920 = vmatpush3.bf16.msra.mxu1 %v2393_v10 }
 0xe20   :  { %1901 = vmatprep.subr.bf16.mxu0 %v2253_v0  ;;  %1921 = vmatprep.subr.bf16.mxu1 %v2253_v0 }
 0xe23   :  { %1902 = vmatpush3.bf16.msra.mxu0 %v2473_v59  ;;  %1922 = vmatpush3.bf16.msra.mxu1 %v2396_v14 }
 0xe24   :  { %1903 = vmatprep.subr.bf16.mxu0 %v2253_v0  ;;  %1923 = vmatprep.subr.bf16.mxu1 %v2253_v0 }
 0xe27   :  { %1904 = vmatpush3.bf16.msra.mxu0 %v2477_v60  ;;  %1924 = vmatpush3.bf16.msra.mxu1 %v2405_v18 }
 0xe28   :  { %1905 = vmatprep.subr.bf16.mxu0 %v2253_v0  ;;  %1925 = vmatprep.subr.bf16.mxu1 %v2253_v0 }
 0xe2b   :  { %1906 = vmatpush3.bf16.msra.mxu0 %v2481_v61  ;;  %1926 = vmatpush3.bf16.msra.mxu1 %v2408_v20 }
 0xe2c   :  { %1931 = vmatprep.subr.bf16.mxu0 %v2253_v0  ;;  %1951 = vmatprep.subr.bf16.mxu1 %v2253_v0 }
 0xee1   :  { %v964_v4 = vpop.f32.mrb[24].mxu0  ;;  %v1004_v6 = vpop.f32.mrb[20].mxu1 }
 0xee2   :  { %v2759_v10 = vadd.f32 %v2752_v2, %v964_v4  ;;  %v1869_v14 = vpop.f32.mrb[25].mxu0  ;;  %v1889_v18 = vpop.f32.mrb[21].mxu1  ;;  %v1017_v20 = vadd.f32 %v1004_v6, %v2433_v26  ;;  %v1010_v30 = vadd.f32 %v1004_v6, %v234_v19 }
 0xee3   :  { %v967_v24 = vpop.f32.mrb[26].mxu0  ;;  %v1007_v33 = vpop.f32.mrb[22].mxu1 }
 0xee4   :  { %v1336_v25 = vmax.f32 %v2756_v8, %v2759_v10  ;;  %1019 = vrot.lane.b32.xlu0 %v1017_v20, %s2247_s28  ;;  %v1870_v27 = vpop.f32.mrb[27].mxu0  ;;  %v1890_v29 = vpop.f32.mrb[23].mxu1  ;;  %v1472_v31 = vmul.f32 -1.442695, %v1010_v30  ;;  %v239_v33 = vadd.f32 %v2487_v9, %v2447_v36 }
 0xee6   :  { %2059 = vpow2.f32 %v1472_v31 }
 0xef0   :  { %v2060_v32 = vpop.eup %2059 }
 0xef1   :  { %v1014_v34 = vadd.f32 1.0, %v2060_v32 }
 0xef3   :  { %2061 = vrcp.f32 %v1014_v34 }
 0xefd   :  { %v2062_v28 = vpop.eup %2061 }
 0xefe   :  { %v1029_v44 = vsub.f32 1.0, %v2062_v28 }
 0xf56   :  { %v1020_v38 = vpop.permute.xlu0 %1019 }
 0xf57   :  { %v1022_v39 = vmul.f32 %v2062_v28, %v1020_v38 }
 0xf59   :  { %1024 = vrot.lane.b32.xlu1 %v1022_v39, %s2247_s28 }
 0xf5d   :  { %1036 = vrot.lane.b32.xlu1 %v928_v40, %s2255_s5 }
 0xfcb   :  { %v1025_v41 = vpop.permute.xlu1 %1024 }
 0xfcc   :  { %v1027_v42 = vadd.f32 %v1025_v41, %v234_v19 }
 0xfce   :  { %2063 = vtanh.f32 %v1027_v42 }
 0xfcf   :  { %v1037_v43 = vpop.permute.xlu1 %1036 }
 0xfd0   :  { %v1039_v46 = vmul.f32 %v2062_v28, %v1037_v43 }
 0xfd8   :  { %v2064_v13 = vpop.eup %2063 }
 0xfd9   :  { %1031 = vrot.lane.b32.xlu0 %v2064_v13, %s2256_s26 }
0x104b   :  { %v1032_v35 = vpop.permute.xlu0 %1031 }
0x104c   :  { %v1034_v49 = vmul.f32 %v1032_v35, %v1029_v44 }
0x104e   :  { %v1040_v50 = vadd.f32 %v1039_v46, %v1034_v49 }
0x1050   :  { %1042 = vrot.lane.b32.xlu0 %v1040_v50, %s2256_s26 }
0x10c2   :  { %v2773_v51 = vpop.permute.xlu0 %1042 }
0x10c3   :  { %v1474_v52 = vpack.c.bf16 %v2773_v51, %v2773_v51  ;;  %v1045_v28 = vsel %vm411_vm1, %v2773_v51, 0.0 }
0x10c5   :  { %1908 = vmatmul.mubr.msk.bf16.vlgmr.msra.gmra.mrb[28].mxu0 %vm2497_vm2, %v1474_v52  ;;  %1928 = vmatmul.mubr.msk.bf16.vlgmr.msra.gmra.mrb[24].mxu1 %vm2497_vm2, %v1474_v52 }
0x10c6   :  { %1932 = vmatpush3.bf16.msra.mxu0 %v2451_v47  ;;  %1952 = vmatpush3.bf16.msra.mxu1 %v2095_v53 }
0x10c7   :  { %1933 = vmatprep.subr.bf16.mxu0 %v2253_v0  ;;  %1953 = vmatprep.subr.bf16.mxu1 %v2253_v0 }
0x10c8   :  { %1947 = vmatprep.mubr.msk.bf16.mxu0 %vm2254_vm0, %v2253_v0  ;;  %1967 = vmatprep.mubr.msk.bf16.mxu1 %vm2254_vm0, %v2253_v0 }
0x10ca   :  { %1934 = vmatpush3.bf16.msra.mxu0 %v2453_v48  ;;  %1954 = vmatpush3.bf16.msra.mxu1 %v2096_v54 }
0x10cb   :  { %1935 = vmatprep.subr.bf16.mxu0 %v2253_v0  ;;  %1955 = vmatprep.subr.bf16.mxu1 %v2253_v0 }
0x10ce   :  { %1936 = vmatpush3.bf16.msra.mxu0 %v2458_v55  ;;  %1956 = vmatpush3.bf16.msra.mxu1 %v2097_v62 }
0x10cf   :  { %1937 = vmatprep.subr.bf16.mxu0 %v2253_v0  ;;  %1957 = vmatprep.subr.bf16.mxu1 %v2253_v0 }
0x10d2   :  { %1938 = vmatpush3.bf16.msra.mxu0 %v2465_v57  ;;  %1958 = vmatpush3.bf16.msra.mxu1 %v2098_v63 }
0x10d3   :  { %1939 = vmatprep.subr.bf16.mxu0 %v2253_v0  ;;  %1959 = vmatprep.subr.bf16.mxu1 %v2253_v0 }
0x10d6   :  { %1940 = vmatpush3.bf16.msra.mxu0 %v2469_v58  ;;  %1960 = vmatpush3.bf16.msra.mxu1 %v2099_v1 }
0x10d7   :  { %1941 = vmatprep.subr.bf16.mxu0 %v2253_v0  ;;  %1961 = vmatprep.subr.bf16.mxu1 %v2253_v0 }
0x10da   :  { %1942 = vmatpush3.bf16.msra.mxu0 %v2473_v59  ;;  %1962 = vmatpush3.bf16.msra.mxu1 %v2100_v3 }
0x10db   :  { %1943 = vmatprep.subr.bf16.mxu0 %v2253_v0  ;;  %1963 = vmatprep.subr.bf16.mxu1 %v2253_v0 }
0x10de   :  { %1944 = vmatpush3.bf16.msra.mxu0 %v2477_v60  ;;  %1964 = vmatpush3.bf16.msra.mxu1 %v2101_v11 }
0x10df   :  { %1945 = vmatprep.subr.bf16.mxu0 %v2253_v0  ;;  %1965 = vmatprep.subr.bf16.mxu1 %v2253_v0 }
0x10e2   :  { %1946 = vmatpush3.bf16.msra.mxu0 %v2481_v61  ;;  %1966 = vmatpush3.bf16.msra.mxu1 %v2102_v5 }
0x10e3   :  { %1971 = vmatprep.subr.bf16.mxu0 %v2253_v0 }
0x1198   :  { %v1081_v7 = vpop.f32.mrb[28].mxu0  ;;  %v1121_v15 = vpop.f32.mrb[24].mxu1 }
0x1199   :  { %v2813_v21 = vadd.f32 %v2752_v2, %v1081_v7  ;;  %v1909_v22 = vpop.f32.mrb[29].mxu0  ;;  %v1929_v23 = vpop.f32.mrb[25].mxu1  ;;  %v1134_v4 = vadd.f32 %v1121_v15, %v2433_v26  ;;  %v1127_v27 = vadd.f32 %v1121_v15, %v239_v33 }
0x119a   :  { %v1084_v6 = vpop.f32.mrb[30].mxu0  ;;  %v1124_v14 = vpop.f32.mrb[26].mxu1 }
0x119b   :  { %v1337_v18 = vmax.f32 %v2810_v17, %v2813_v21  ;;  %1136 = vrot.lane.b32.xlu1 %v1134_v4, %s2247_s28  ;;  %v1910_v20 = vpop.f32.mrb[31].mxu0  ;;  %v1930_v24 = vpop.f32.mrb[27].mxu1  ;;  %v1479_v29 = vmul.f32 -1.442695, %v1127_v27 }
0x119c   :  { %v1331_v20 = vadd.f32 %v2752_v2, %v2694_v37 }
0x119d   :  { %v2822_v56 = vmax.f32 %v1336_v25, %v1337_v18  ;;  %2065 = vpow2.f32 %v1479_v29 }
0x11a7   :  { %v2066_v19 = vpop.eup %2065 }
0x11a8   :  { %v1131_v30 = vadd.f32 1.0, %v2066_v19 }
0x11aa   :  { %2067 = vrcp.f32 %v1131_v30 }
0x11b4   :  { %v2068_v31 = vpop.eup %2067 }
0x11b5   :  { %v1146_v39 = vsub.f32 1.0, %v2068_v31 }
0x120d   :  { %v1137_v32 = vpop.permute.xlu1 %1136 }
0x120e   :  { %v1139_v34 = vmul.f32 %v2068_v31, %v1137_v32 }
0x1210   :  { %1141 = vrot.lane.b32.xlu0 %v1139_v34, %s2247_s28 }
0x1214   :  { %1153 = vrot.lane.b32.xlu0 %v1045_v28, %s2255_s5 }
0x1282   :  { %v1142_v25 = vpop.permute.xlu0 %1141 }
0x1283   :  { %v1144_v38 = vadd.f32 %v1142_v25, %v239_v33 }
0x1285   :  { %2069 = vtanh.f32 %v1144_v38 }
0x1286   :  { %v1154_v9 = vpop.permute.xlu0 %1153 }
0x1287   :  { %v1156_v41 = vmul.f32 %v2068_v31, %v1154_v9 }
0x128f   :  { %v2070_v36 = vpop.eup %2069 }
0x1290   :  { %1148 = vrot.lane.b32.xlu1 %v2070_v36, %s2256_s26 }
0x1302   :  { %v1149_v40 = vpop.permute.xlu1 %1148 }
0x1303   :  { %v1151_v42 = vmul.f32 %v1149_v40, %v1146_v39 }
0x1305   :  { %v1157_v13 = vadd.f32 %v1156_v41, %v1151_v42 }
0x1307   :  { %1159 = vrot.lane.b32.xlu1 %v1157_v13, %s2256_s26 }
0x1379   :  { %v1160_v43 = vpop.permute.xlu1 %1159 }
0x137a   :  { %v1481_v44 = vpack.c.bf16 %v1160_v43, %v1160_v43  ;;  %v1162_v1 = vsel %vm411_vm1, %v1160_v43, 0.0 }
0x137c   :  { %1948 = vmatmul.mubr.msk.bf16.vlgmr.msra.gmra.mrb[32].mxu0 %vm2497_vm2, %v1481_v44  ;;  %1968 = vmatmul.mubr.msk.bf16.vlgmr.msra.gmra.mrb[28].mxu1 %vm2497_vm2, %v1481_v44 }
0x137d   :  { %1972 = vmatpush3.bf16.msra.mxu0 %v2451_v47  ;;  %1987 = vmatprep.mubr.msk.bf16.mxu0 %vm2254_vm0, %v2253_v0 }
0x137e   :  { %1973 = vmatprep.subr.bf16.mxu0 %v2253_v0 }
0x1381   :  { %1974 = vmatpush3.bf16.msra.mxu0 %v2453_v48 }
0x1382   :  { %1975 = vmatprep.subr.bf16.mxu0 %v2253_v0 }
0x1385   :  { %1976 = vmatpush3.bf16.msra.mxu0 %v2458_v55  ;;  %v1330_v55 = vadd.f32 %v2752_v2, %v2643_v45 }
0x1386   :  { %1977 = vmatprep.subr.bf16.mxu0 %v2253_v0 }
0x1389   :  { %1978 = vmatpush3.bf16.msra.mxu0 %v2465_v57 }
0x138a   :  { %1979 = vmatprep.subr.bf16.mxu0 %v2253_v0 }
0x138d   :  { %1980 = vmatpush3.bf16.msra.mxu0 %v2469_v58 }
0x138e   :  { %1981 = vmatprep.subr.bf16.mxu0 %v2253_v0 }
0x1391   :  { %1982 = vmatpush3.bf16.msra.mxu0 %v2473_v59 }
0x1392   :  { %1983 = vmatprep.subr.bf16.mxu0 %v2253_v0 }
0x1395   :  { %1984 = vmatpush3.bf16.msra.mxu0 %v2477_v60 }
0x1396   :  { %1985 = vmatprep.subr.bf16.mxu0 %v2253_v0 }
0x1399   :  { %1986 = vmatpush3.bf16.msra.mxu0 %v2481_v61  ;;  %v2103_v61 = vld [vmem:[%s2896_s4] ss:$0 sm:$0xff]  ;;  %s2257_s4 = smov [#allocation11]  }
0x139a   :  { %v242_v51 = vadd.f32 %v2103_v61, %v2491_v12 }
0x144f   :  { %v1198_v47 = vpop.f32.mrb[32].mxu0  ;;  %v1238_v48 = vpop.f32.mrb[28].mxu1 }
0x1450   :  { %v1334_v57 = vadd.f32 %v2752_v2, %v1198_v47  ;;  %v1949_v58 = vpop.f32.mrb[33].mxu0  ;;  %v1969_v35 = vpop.f32.mrb[29].mxu1  ;;  %v1251_v46 = vadd.f32 %v1238_v48, %v2433_v26  ;;  %v1244_v45 = vadd.f32 %v1238_v48, %v242_v51 }
0x1451   :  { %v1201_v59 = vpop.f32.mrb[34].mxu0  ;;  %v1241_v49 = vpop.f32.mrb[30].mxu1 }
0x1452   :  { %v1338_v50 = vmax.f32 %v1330_v55, %v1334_v57  ;;  %1253 = vrot.lane.b32.xlu0 %v1251_v46, %s2247_s28  ;;  %v1950_v60 = vpop.f32.mrb[35].mxu0  ;;  %v1970_v0 = vpop.f32.mrb[31].mxu1  ;;  %v1486_v52 = vmul.f32 -1.442695, %v1244_v45 }
0x1454   :  { %2071 = vpow2.f32 %v1486_v52 }
0x145e   :  { %v2072_v53 = vpop.eup %2071 }
0x145f   :  { %v1248_v54 = vadd.f32 1.0, %v2072_v53 }
0x1461   :  { %2073 = vrcp.f32 %v1248_v54 }
0x146b   :  { %v2074_v26 = vpop.eup %2073 }
0x146c   :  { %v1263_v7 = vsub.f32 1.0, %v2074_v26 }
0x14c4   :  { %v1254_v62 = vpop.permute.xlu0 %1253 }
0x14c5   :  { %v1256_v63 = vmul.f32 %v2074_v26, %v1254_v62 }
0x14c7   :  { %1258 = vrot.lane.b32.xlu1 %v1256_v63, %s2247_s28  ;;  %s1397_s28 = sshll.u32 %s2257_s4, 4  ;;  %s1398_s28 = int_to_ptr.vmem [resolvable:$true] %s1397_s28 }
0x14c8   :  { %s2214_s9 = scalar_lea.vmem %s1398_s28, 1024  ;;  %p2219_p13 = scmp.lt.s32.totalorder %s1398_s28, %s1398_s28 }
0x14c9   :  { %p2215_p12 = scmp.ne.s32.totalorder %s1398_s28, %s2214_s9  ;;  %p2220_p0 = scmp.lt.s32.totalorder %s2214_s9, %s2214_s9 }
0x14cb   :  { %1270 = vrot.lane.b32.xlu1 %v1162_v1, %s2255_s5  ;;  %p2221_p1 = por %p2220_p0, %p2219_p13 }
0x14cd   :  { %p2222_p2 = pnand %p2221_p1, %p2215_p12 }
0x1539   :  { %v1259_v3 = vpop.permute.xlu1 %1258 }
0x153a   :  { %v1261_v11 = vadd.f32 %v1259_v3, %v242_v51 }
0x153c   :  { %2075 = vtanh.f32 %v1261_v11 }
0x153d   :  { %v1271_v12 = vpop.permute.xlu1 %1270 }
0x153e   :  { %v1273_v22 = vmul.f32 %v2074_v26, %v1271_v12 }
0x1546   :  { %v2076_v5 = vpop.eup %2075 }
0x1547   :  { %1265 = vrot.lane.b32.xlu0 %v2076_v5, %s2256_s26 }
0x15b9   :  { %v1266_v15 = vpop.permute.xlu0 %1265 }
0x15ba   :  { %v1268_v23 = vmul.f32 %v1266_v15, %v1263_v7 }
0x15bc   :  { %v1274_v4 = vadd.f32 %v1273_v22, %v1268_v23 }
0x15be   :  { %1276 = vrot.lane.b32.xlu0 %v1274_v4, %s2256_s26 }
0x1630   :  { %v1277_v6 = vpop.permute.xlu0 %1276 }
0x1631   :  { %v1488_v14 = vpack.c.bf16 %v1277_v6, %v1277_v6 }
0x1633   :  { %1988 = vmatmul.mubr.msk.bf16.vlgmr.msra.gmra.mrb[36].mxu0 %vm2497_vm2, %v1488_v14 }
0x1706   :  { %v1315_v18 = vpop.f32.mrb[36].mxu0 }
0x1707   :  { %v1335_v24 = vadd.f32 %v2752_v2, %v1315_v18  ;;  %v1989_v33 = vpop.f32.mrb[37].mxu0 }
0x1708   :  { %v1318_v27 = vpop.f32.mrb[38].mxu0 }
0x1709   :  { %v1339_v29 = vmax.f32 %v1331_v20, %v1335_v24  ;;  %v1990_v19 = vpop.f32.mrb[39].mxu0 }
0x170b   :  { %v1341_v30 = vmax.f32 %v1338_v50, %v1339_v29 }
0x170d   :  { %v1342_v31 = vmax.f32 %v2822_v56, %v1341_v30 }
0x170f   :  { %v1343_v32 = vsub.f32 %v2756_v8, %v1342_v31  ;;  %v1344_v34 = vsub.f32 %v2810_v17, %v1342_v31  ;;  %v1345_v28 = vsub.f32 %v1330_v55, %v1342_v31  ;;  %v1346_v16 = vsub.f32 %v1331_v20, %v1342_v31 }
0x1710   :  { %v1347_v25 = vsub.f32 %v2759_v10, %v1342_v31  ;;  %v1348_v38 = vsub.f32 %v2813_v21, %v1342_v31  ;;  %v1349_v37 = vsub.f32 %v1334_v57, %v1342_v31  ;;  %v1350_v36 = vsub.f32 %v1335_v24, %v1342_v31 }
0x1711   :  { %v1351_v2 = vmul.f32 1.442695, %v1343_v32  ;;  %v1353_v9 = vmul.f32 1.442695, %v1344_v34  ;;  %v1355_v39 = vmul.f32 1.442695, %v1345_v28 }
0x1712   :  { %v1357_v40 = vmul.f32 1.442695, %v1346_v16  ;;  %v1359_v56 = vmul.f32 1.442695, %v1347_v25  ;;  %v1361_v8 = vmul.f32 1.442695, %v1348_v38 }
0x1713   :  { %2077 = vpow2.f32 %v1351_v2  ;;  %v1363_v17 = vmul.f32 1.442695, %v1349_v37  ;;  %v1365_v41 = vmul.f32 1.442695, %v1350_v36 }
0x1714   :  { %2079 = vpow2.f32 %v1353_v9 }
0x1715   :  { %2081 = vpow2.f32 %v1355_v39 }
0x1716   :  { %2083 = vpow2.f32 %v1357_v40 }
0x1717   :  { %2085 = vpow2.f32 %v1359_v56 }
0x1718   :  { %2087 = vpow2.f32 %v1361_v8 }
0x1719   :  { %2089 = vpow2.f32 %v1363_v17 }
0x171a   :  { %2091 = vpow2.f32 %v1365_v41 }
0x171d   :  { %v2078_v42 = vpop.eup %2077 }
0x171e   :  { %v2080_v10 = vpop.eup %2079 }
0x171f   :  { %v1367_v21 = vadd.f32 %v2080_v10, %v2078_v42  ;;  %v2082_v13 = vpop.eup %2081 }
0x1720   :  { %v2084_v44 = vpop.eup %2083 }
0x1721   :  { %v1368_v43 = vadd.f32 %v2082_v13, %v1367_v21  ;;  %v2086_v48 = vpop.eup %2085 }
0x1722   :  { %v2088_v57 = vpop.eup %2087 }
0x1723   :  { %v1369_v47 = vadd.f32 %v2084_v44, %v1368_v43  ;;  %v2090_v35 = vpop.eup %2089 }
0x1724   :  { %v2092_v59 = vpop.eup %2091 }
0x1725   :  { %v1370_v55 = vadd.f32 %v2086_v48, %v1369_v47 }
0x1727   :  { %v1371_v58 = vadd.f32 %v2088_v57, %v1370_v55 }
0x1729   :  { %v1372_v46 = vadd.f32 %v2090_v35, %v1371_v58 }
0x172b   :  { %v1373_v49 = vadd.f32 %v2092_v59, %v1372_v46 }
0x172d   :  { %2093 = vlog2.f32 %v1373_v49 }
0x1737   :  { %v2094_v50 = vpop.eup %2093 }
0x1738   :  { %v1375_v60 = vmul.f32 0.6931472, %v2094_v50 }
0x173a   :  { %v1383_v0 = vsub.f32 %v1350_v36, %v1375_v60  ;;  %v1376_v61 = vsub.f32 %v1343_v32, %v1375_v60  ;;  %v1377_v51 = vsub.f32 %v1344_v34, %v1375_v60  ;;  %v1378_v45 = vsub.f32 %v1345_v28, %v1375_v60 }
0x173b   :  { %v1379_v52 = vsub.f32 %v1346_v16, %v1375_v60  ;;  %v1380_v53 = vsub.f32 %v1347_v25, %v1375_v60  ;;  %v1381_v54 = vsub.f32 %v1348_v38, %v1375_v60  ;;  %v1382_v26 = vsub.f32 %v1349_v37, %v1375_v60 }
0x173c   :  { %1391 = vst [vmem:[#allocation11 + $0x38] sm:$0xff] %v1383_v0  ;;  %1384 = vst [vmem:[#allocation11] sm:$0xff] %v1376_v61 }
0x173d   :  { %1385 = vst [vmem:[#allocation11 + $0x8] sm:$0xff] %v1377_v51  ;;  %1386 = vst [vmem:[#allocation11 + $0x10] sm:$0xff] %v1378_v45 }
0x173e   :  { %1387 = vst [vmem:[#allocation11 + $0x18] sm:$0xff] %v1379_v52  ;;  %1388 = vst [vmem:[#allocation11 + $0x20] sm:$0xff] %v1380_v53 }
0x173f   :  { %1389 = vst [vmem:[#allocation11 + $0x28] sm:$0xff] %v1381_v54  ;;  %1390 = vst [vmem:[#allocation11 + $0x30] sm:$0xff] %v1382_v26 }
0x1740   :  { %2225 = shalt.err (!%p2222_p2)
}
0x1741   :  { %s2226_s0 = scalar_lea.hbm %s2900_s8, 1024 }
0x1742   :  { %p2227_p3 = scmp.ne.s32.totalorder %s2900_s8, %s2226_s0  ;;  %p2230_p4 = scmp.lt.u32.totalorder %s2226_s0, %s2900_s8 }
0x1744   :  { %p2232_p5 = pnand %p2230_p4, %p2227_p3 }
0x1746   :  { %2235 = shalt.err (!%p2232_p5)
}
0x1747   :  { %1403 = dma.vmem_to_hbm [thread:$0]  %s1398_s28, 1024, %s2900_s8, [#allocation4], %s2249_s3, %s2249_s3, %s2250_s18  }
0x1748   :  { %2242 = dma.done.wait [#allocation4], 1024  }
0x1749   :  { %2243 = vsyncadd [#allocation4], 4294966272 }
0x174a   :  { %1407 = vsyncpa [#allocation3], 1 }
0x174b   :  { %1408 = vsyncpa [#allocation6], 1 }
0x174c   :  { %1409 = vsyncpa [#allocation9], 1 }
0x174d   :  { %1410 = vsyncpa [#allocation4], 1 }

</bundles_post_ra>
